<compile_context>
chip_gen: v5e
topology: v5e:2x2
jax: 0.10.0
libtpu: 0.0.40
codegen_flags: <defaults>
</compile_context>

<pallas_src>
import math
import functools

import jax
import jax.numpy as jnp
from jax.experimental import pallas as pl
from jax.experimental.pallas import tpu as pltpu


def _layernorm(x, gamma, beta, eps=1e-5):
    mu = jnp.mean(x, axis=-1, keepdims=True)
    var = jnp.mean((x - mu) ** 2, axis=-1, keepdims=True)
    return (x - mu) * jax.lax.rsqrt(var + eps) * gamma + beta


def transformer_layer_kernel(S, D, H, F, F_CHUNK,
                             x_ref,
                             wqkv_ref, bqkv_ref, wo_ref, bo_ref,
                             ln1g_ref, ln1b_ref,
                             w1_ref, b1_ref, w2_ref, b2_ref,
                             ln2g_ref, ln2b_ref,
                             fcw_ref, fcb_ref,
                             out_ref,
                             act_ref):
    """One grid step = one (batch element, encoder layer).

    The (S, D) f32 activation is carried across the layer axis in `act_ref`
    (VMEM scratch).  Weights arrive per-layer as bf16 blocks streamed by the
    Pallas pipeline.  Mean-pool + fc run on the last layer step.
    """
    hd = D // H
    scale = 1.0 / math.sqrt(hd)
    bf16 = jnp.bfloat16
    l = pl.program_id(1)

    # ---- layer 0: load this batch element's embedded+pos-encoded input ----
    @pl.when(l == 0)
    def _():
        act_ref[...] = x_ref[0]

    x = act_ref[...]                                                     # (S, D) f32

    # ---- QKV projection, batched over 3*H per-head weight slabs ----
    # TODO(synk): for large S*D, switch to a single (S,D)@(D,3D) matmul + head-split
    #             relayout instead of broadcasting the activation 3H times.
    xb = jnp.broadcast_to(x.astype(bf16), (3 * H, S, D))
    qkvh = jnp.einsum('gsd,gdf->gsf', xb, wqkv_ref[0],
                      preferred_element_type=jnp.float32) + bqkv_ref[0]  # (3H, S, hd)
    qh = qkvh[0:H]                                                       # (H, S, hd)
    kh = qkvh[H:2 * H]
    vh = qkvh[2 * H:3 * H]

    # ---- attention: one batched einsum over heads (no per-head loop) ----
    # TODO(synk): for long sequences, tile over KV blocks with online softmax
    #             (flash pattern) instead of materializing (H, S, S) scores.
    s = jnp.einsum('hqd,hkd->hqk', qh.astype(bf16), kh.astype(bf16),
                   preferred_element_type=jnp.float32) * scale           # (H, S, S)
    s = s - jnp.max(s, axis=-1, keepdims=True)
    p = jnp.exp(s)
    p = p * pl.reciprocal(jnp.sum(p, axis=-1, keepdims=True), approx=True)
    ctx = jnp.einsum('hqk,hkd->hqd', p.astype(bf16), vh.astype(bf16),
                     preferred_element_type=jnp.float32)                 # (H, S, hd)

    # ---- output projection: per-head partials, summed over the head axis ----
    attn = jnp.einsum('hsd,hde->hse', ctx.astype(bf16), wo_ref[0],
                      preferred_element_type=jnp.float32)                # (H, S, D)
    attn = jnp.sum(attn, axis=0) + bo_ref[0]                             # (S, D)

    # ---- residual + LayerNorm 1 (post-norm) ----
    y = _layernorm(x + attn, ln1g_ref[0], ln1b_ref[0])

    # ---- feed-forward, tiled over dim_feedforward so (S, F) never lives in full ----
    y_b = y.astype(bf16)
    h2 = jnp.zeros((S, D), jnp.float32)
    for c in range(F // F_CHUNK):
        c0 = c * F_CHUNK
        w1c = w1_ref[0, :, c0:c0 + F_CHUNK]                              # (D, Fc) bf16
        b1c = b1_ref[0, :, c0:c0 + F_CHUNK]                              # (1, Fc) f32
        h1 = jnp.maximum(
            jnp.dot(y_b, w1c, preferred_element_type=jnp.float32) + b1c, 0.0)
        w2c = w2_ref[0, c0:c0 + F_CHUNK, :]                              # (Fc, D) bf16
        h2 = h2 + jnp.dot(h1.astype(bf16), w2c,
                          preferred_element_type=jnp.float32)
    h2 = h2 + b2_ref[0]

    # ---- residual + LayerNorm 2 -> carry to next layer ----
    act_ref[...] = _layernorm(y + h2, ln2g_ref[0], ln2b_ref[0])

    # ---- last layer: mean pool over the sequence + classifier head ----
    @pl.when(l == pl.num_programs(1) - 1)
    def _():
        pooled = jnp.mean(act_ref[...], axis=0, keepdims=True)           # (1, D)
        logits = jnp.dot(pooled.astype(bf16), fcw_ref[...],
                         preferred_element_type=jnp.float32) + fcb_ref[...]
        out_ref[0] = logits                                              # (1, C_PAD)


# ----------------------------- params / wrappers ----------------------------

def make_positional_encoding(max_len, d_model):
    position = jnp.arange(max_len, dtype=jnp.float32)[:, None]
    div_term = jnp.exp(jnp.arange(0, d_model, 2, dtype=jnp.float32)
                       * (-math.log(10000.0) / d_model))
    pe = jnp.zeros((max_len, d_model), dtype=jnp.float32)
    pe = pe.at[:, 0::2].set(jnp.sin(position * div_term))
    pe = pe.at[:, 1::2].set(jnp.cos(position * div_term))
    return pe                                                            # (max_len, D)


def init_params(key, vocab_size, embed_dim, num_heads, num_layers, num_classes,
                dim_feedforward=2048, max_len=5000):
    D, H, F = embed_dim, num_heads, dim_feedforward
    assert D % H == 0
    hd = D // H
    C_PAD = max(128, ((num_classes + 127) // 128) * 128)                 # lane-dense head
    keys = jax.random.split(key, 2 + num_layers)
    sd_d = 1.0 / math.sqrt(D)
    sd_f = 1.0 / math.sqrt(F)

    def split_cols(w):            # (D, D) -> (H, D, hd): head h <- cols [h*hd:(h+1)*hd]
        return jnp.transpose(w.reshape(D, H, hd), (1, 0, 2))

    wqkv, bqkv, wo, bo = [], [], [], []
    ln1g, ln1b, w1, b1, w2, b2, ln2g, ln2b = [], [], [], [], [], [], [], []
    for li in range(num_layers):
        ks = jax.random.split(keys[2 + li], 6)
        wq = jax.random.normal(ks[0], (D, D), jnp.float32) * sd_d
        wk = jax.random.normal(ks[1], (D, D), jnp.float32) * sd_d
        wv = jax.random.normal(ks[2], (D, D), jnp.float32) * sd_d
        wqkv.append(jnp.concatenate([split_cols(wq), split_cols(wk), split_cols(wv)],
                                    axis=0))                             # (3H, D, hd)
        bqkv.append(jnp.zeros((3 * H, 1, hd), jnp.float32))
        wo_l = jax.random.normal(ks[3], (D, D), jnp.float32) * sd_d
        wo.append(wo_l.reshape(H, hd, D))                                # (H, hd, D)
        bo.append(jnp.zeros((1, D), jnp.float32))
        ln1g.append(jnp.ones((1, D), jnp.float32))
        ln1b.append(jnp.zeros((1, D), jnp.float32))
        w1.append(jax.random.normal(ks[4], (D, F), jnp.float32) * sd_d)
        b1.append(jnp.zeros((1, F), jnp.float32))
        w2.append(jax.random.normal(ks[5], (F, D), jnp.float32) * sd_f)
        b2.append(jnp.zeros((1, D), jnp.float32))
        ln2g.append(jnp.ones((1, D), jnp.float32))
        ln2b.append(jnp.zeros((1, D), jnp.float32))

    layers = {
        # MXU operands streamed as bf16; biases / LayerNorm params stay f32.
        "wqkv": jnp.stack(wqkv).astype(jnp.bfloat16),   # (L, 3H, D, hd)
        "bqkv": jnp.stack(bqkv),                        # (L, 3H, 1, hd) f32
        "wo":   jnp.stack(wo).astype(jnp.bfloat16),     # (L, H, hd, D)
        "bo":   jnp.stack(bo),                          # (L, 1, D)
        "ln1_g": jnp.stack(ln1g), "ln1_b": jnp.stack(ln1b),
        "w1":   jnp.stack(w1).astype(jnp.bfloat16),     # (L, D, F)
        "b1":   jnp.stack(b1),                          # (L, 1, F)
        "w2":   jnp.stack(w2).astype(jnp.bfloat16),     # (L, F, D)
        "b2":   jnp.stack(b2),                          # (L, 1, D)
        "ln2_g": jnp.stack(ln2g), "ln2_b": jnp.stack(ln2b),
    }

    fc_w = jax.random.normal(keys[1], (D, num_classes), jnp.float32) * sd_d
    fc_w_pad = jnp.zeros((D, C_PAD), jnp.float32).at[:, :num_classes].set(fc_w)

    return {
        "embed_dim": D,
        "num_heads": H,
        "num_classes": num_classes,
        "embedding": jax.random.normal(keys[0], (vocab_size, D), jnp.float32) * 0.02,
        "pe": make_positional_encoding(max_len, D),
        "fc_w": fc_w_pad.astype(jnp.bfloat16),          # (D, C_PAD)
        "fc_b": jnp.zeros((1, C_PAD), jnp.float32),
        "layers": layers,
    }


def transformer_classifier_forward(src, params):
    B, S = src.shape
    D = params["embed_dim"]
    H = params["num_heads"]
    C = params["num_classes"]
    hd = D // H
    lw = params["layers"]
    L = lw["wqkv"].shape[0]
    F = lw["w1"].shape[2]
    C_PAD = params["fc_w"].shape[1]
    F_CHUNK = 512 if F % 512 == 0 else F

    # ---- glue done with XLA (data-dependent gather has no rectangular BlockSpec) ----
    # TODO(synk): embedding gather stays outside the kernel (would need manual DMA gather).
    x = params["embedding"][src] * math.sqrt(D)                          # (B, S, D) f32
    # Reproduces the PyTorch pe[:x.size(0)] (batch-dim) indexing of PositionalEncoding.
    x = x + params["pe"][:B][:, None, :]

    kern = functools.partial(transformer_layer_kernel, S, D, H, F, F_CHUNK)

    wmap3 = lambda b, l: (l, 0, 0)
    wmap4 = lambda b, l: (l, 0, 0, 0)

    in_specs = [
        pl.BlockSpec((1, S, D), lambda b, l: (b, 0, 0)),                 # x
        pl.BlockSpec((1, 3 * H, D, hd), wmap4),                          # wqkv
        pl.BlockSpec((1, 3 * H, 1, hd), wmap4),                          # bqkv
        pl.BlockSpec((1, H, hd, D), wmap4),                              # wo
        pl.BlockSpec((1, 1, D), wmap3),                                  # bo
        pl.BlockSpec((1, 1, D), wmap3),                                  # ln1_g
        pl.BlockSpec((1, 1, D), wmap3),                                  # ln1_b
        pl.BlockSpec((1, D, F), wmap3),                                  # w1
        pl.BlockSpec((1, 1, F), wmap3),                                  # b1
        pl.BlockSpec((1, F, D), wmap3),                                  # w2
        pl.BlockSpec((1, 1, D), wmap3),                                  # b2
        pl.BlockSpec((1, 1, D), wmap3),                                  # ln2_g
        pl.BlockSpec((1, 1, D), wmap3),                                  # ln2_b
        pl.BlockSpec((D, C_PAD), lambda b, l: (0, 0)),                   # fc_w
        pl.BlockSpec((1, C_PAD), lambda b, l: (0, 0)),                   # fc_b
    ]
    args = (x,
            lw["wqkv"], lw["bqkv"], lw["wo"], lw["bo"],
            lw["ln1_g"], lw["ln1_b"],
            lw["w1"], lw["b1"], lw["w2"], lw["b2"],
            lw["ln2_g"], lw["ln2_b"],
            params["fc_w"], params["fc_b"])

    out = pl.pallas_call(
        kern,
        out_shape=jax.ShapeDtypeStruct((B, 1, C_PAD), jnp.float32),
        grid=(B, L),
        in_specs=in_specs,
        out_specs=pl.BlockSpec((1, 1, C_PAD), lambda b, l: (b, 0, 0)),
        scratch_shapes=[pltpu.VMEM((S, D), jnp.float32)],                # activation carry
        compiler_params=pltpu.CompilerParams(
            dimension_semantics=("parallel", "arbitrary"),
            vmem_limit_bytes=32 * 1024 * 1024,
        ),
    )(*args)

    return out[:, 0, :C]                                                 # (B, num_classes)


# ----------------------------- main ------------------------------------------

if __name__ == "__main__":
    vocab_size = 100
    embed_dim = 32
    num_heads = 4
    num_encoder_layers = 2
    num_classes = 5
    batch = 2
    seq_len = 8

    key = jax.random.PRNGKey(0)
    pkey, dkey = jax.random.split(key)
    params = init_params(pkey, vocab_size, embed_dim, num_heads,
                         num_encoder_layers, num_classes)

    src = jax.random.randint(dkey, (batch, seq_len), 0, vocab_size, dtype=jnp.int32)

    logits = transformer_classifier_forward(src, params)
    jax.block_until_ready(logits)
    assert logits.shape == (batch, num_classes)
    assert bool(jnp.all(jnp.isfinite(logits)))
    print("KERNEL_OK")
</pallas_src>

<mosaic_0001>
module attributes {stable_mosaic.version = 11 : i64} {
  func.func @transformer_layer_kernel(%arg0: i32, %arg1: i32, %arg2: memref<1x8x32xf32, #tpu.memory_space<vmem>>, %arg3: memref<1x12x32x8xbf16, #tpu.memory_space<vmem>>, %arg4: memref<1x12x1x8xf32, #tpu.memory_space<vmem>>, %arg5: memref<1x4x8x32xbf16, #tpu.memory_space<vmem>>, %arg6: memref<1x1x32xf32, #tpu.memory_space<vmem>>, %arg7: memref<1x1x32xf32, #tpu.memory_space<vmem>>, %arg8: memref<1x1x32xf32, #tpu.memory_space<vmem>>, %arg9: memref<1x32x2048xbf16, #tpu.memory_space<vmem>>, %arg10: memref<1x1x2048xf32, #tpu.memory_space<vmem>>, %arg11: memref<1x2048x32xbf16, #tpu.memory_space<vmem>>, %arg12: memref<1x1x32xf32, #tpu.memory_space<vmem>>, %arg13: memref<1x1x32xf32, #tpu.memory_space<vmem>>, %arg14: memref<1x1x32xf32, #tpu.memory_space<vmem>>, %arg15: memref<32x128xbf16, #tpu.memory_space<vmem>>, %arg16: memref<1x128xf32, #tpu.memory_space<vmem>>, %arg17: memref<1x1x128xf32, #tpu.memory_space<vmem>>, %arg18: memref<8x32xf32, #tpu.memory_space<vmem>>) attributes {dimension_semantics = [#tpu.dimension_semantics<parallel>, #tpu.dimension_semantics<arbitrary>], iteration_bounds = array<i64: 2, 2>, scalar_prefetch = 0 : i64, scratch_operands = 1 : i64, tpu.core_type = #tpu.core_type<tc>, window_params = [{transform_indices = @transform_0, window_bounds = array<i64: 1, 8, 32>}, {transform_indices = @transform_1, window_bounds = array<i64: 1, 12, 32, 8>}, {transform_indices = @transform_2, window_bounds = array<i64: 1, 12, 1, 8>}, {transform_indices = @transform_3, window_bounds = array<i64: 1, 4, 8, 32>}, {transform_indices = @transform_4, window_bounds = array<i64: 1, 1, 32>}, {transform_indices = @transform_5, window_bounds = array<i64: 1, 1, 32>}, {transform_indices = @transform_6, window_bounds = array<i64: 1, 1, 32>}, {transform_indices = @transform_7, window_bounds = array<i64: 1, 32, 2048>}, {transform_indices = @transform_8, window_bounds = array<i64: 1, 1, 2048>}, {transform_indices = @transform_9, window_bounds = array<i64: 1, 2048, 32>}, {transform_indices = @transform_10, window_bounds = array<i64: 1, 1, 32>}, {transform_indices = @transform_11, window_bounds = array<i64: 1, 1, 32>}, {transform_indices = @transform_12, window_bounds = array<i64: 1, 1, 32>}, {pipeline_mode = #tpu.pipeline_mode<synchronous>, transform_indices = @transform_13, window_bounds = array<i64: 32, 128>}, {pipeline_mode = #tpu.pipeline_mode<synchronous>, transform_indices = @transform_14, window_bounds = array<i64: 1, 128>}, {transform_indices = @transform_15, window_bounds = array<i64: 1, 1, 128>}]} {
    %c0_i32 = arith.constant 0 : i32
    %0 = arith.cmpi eq, %arg1, %c0_i32 : i32
    %1 = arith.extui %0 : i1 to i32
    %c0_i32_0 = arith.constant 0 : i32
    %2 = arith.cmpi ne, %1, %c0_i32_0 : i32
    scf.if %2 {
      %c0_98 = arith.constant 0 : index
      %c0_99 = arith.constant 0 : index
      %c0_100 = arith.constant 0 : index
      %164 = vector.load %arg2[%c0_98, %c0_99, %c0_100] : memref<1x8x32xf32, #tpu.memory_space<vmem>>, vector<1x8x32xf32>
      %165 = vector.shape_cast %164 : vector<1x8x32xf32> to vector<8x32xf32>
      %c0_101 = arith.constant 0 : index
      %c0_102 = arith.constant 0 : index
      %166 = vector.load %arg18[%c0_101, %c0_102] : memref<8x32xf32, #tpu.memory_space<vmem>>, vector<8x32xf32>
      tpu.vector_store %arg18[%c0_101, %c0_102], %165 {strides = array<i32>} : memref<8x32xf32, #tpu.memory_space<vmem>>, vector<8x32xf32>,
    } else {
    }
    %c0 = arith.constant 0 : index
    %c0_1 = arith.constant 0 : index
    %3 = vector.load %arg18[%c0, %c0_1] : memref<8x32xf32, #tpu.memory_space<vmem>>, vector<8x32xf32>
    %4 = arith.truncf %3 : vector<8x32xf32> to vector<8x32xbf16>
    %5 = vector.shape_cast %4 : vector<8x32xbf16> to vector<1x8x32xbf16>
    %6 = vector.broadcast %5 : vector<1x8x32xbf16> to vector<12x8x32xbf16>
    %c0_2 = arith.constant 0 : index
    %c0_3 = arith.constant 0 : index
    %c0_4 = arith.constant 0 : index
    %c0_5 = arith.constant 0 : index
    %7 = vector.load %arg3[%c0_2, %c0_3, %c0_4, %c0_5] : memref<1x12x32x8xbf16, #tpu.memory_space<vmem>>, vector<1x12x32x8xbf16>
    %8 = vector.shape_cast %7 : vector<1x12x32x8xbf16> to vector<12x32x8xbf16>
    "tpu.trace_start"() <{level = 10 : i32, message = "gsd,gdf->gsf"}> : () -> ()
    %cst = arith.constant dense<0.000000e+00> : vector<12x8x8xf32>
    %9 = tpu.matmul %6, %8, %cst {dimension_numbers = #tpu.dot_dimension_numbers<[2], [1], [1], [2], [0, 0, 0, 1, 1, 2], [0], [0]>} : vector<12x8x32xbf16>, vector<12x32x8xbf16>, vector<12x8x8xf32> -> vector<12x8x8xf32>
    "tpu.trace_stop"() : () -> ()
    %c0_6 = arith.constant 0 : index
    %c0_7 = arith.constant 0 : index
    %c0_8 = arith.constant 0 : index
    %c0_9 = arith.constant 0 : index
    %10 = vector.load %arg4[%c0_6, %c0_7, %c0_8, %c0_9] : memref<1x12x1x8xf32, #tpu.memory_space<vmem>>, vector<1x12x1x8xf32>
    %11 = vector.shape_cast %10 : vector<1x12x1x8xf32> to vector<12x1x8xf32>
    %12 = vector.broadcast %11 : vector<12x1x8xf32> to vector<12x8x8xf32>
    %13 = arith.addf %9, %12 : vector<12x8x8xf32>
    %14 = vector.extract_strided_slice %13 {offsets = [0, 0, 0], sizes = [4, 8, 8], strides = [1, 1, 1]} : vector<12x8x8xf32> to vector<4x8x8xf32>
    %15 = vector.extract_strided_slice %13 {offsets = [4, 0, 0], sizes = [4, 8, 8], strides = [1, 1, 1]} : vector<12x8x8xf32> to vector<4x8x8xf32>
    %16 = vector.extract_strided_slice %13 {offsets = [8, 0, 0], sizes = [4, 8, 8], strides = [1, 1, 1]} : vector<12x8x8xf32> to vector<4x8x8xf32>
    %17 = arith.truncf %14 : vector<4x8x8xf32> to vector<4x8x8xbf16>
    %18 = arith.truncf %15 : vector<4x8x8xf32> to vector<4x8x8xbf16>
    "tpu.trace_start"() <{level = 10 : i32, message = "hqd,hkd->hqk"}> : () -> ()
    %cst_10 = arith.constant dense<0.000000e+00> : vector<4x8x8xf32>
    %19 = tpu.matmul %17, %18, %cst_10 {dimension_numbers = #tpu.dot_dimension_numbers<[2], [2], [1], [1], [0, 0, 0, 1, 1, 1], [0], [0]>} : vector<4x8x8xbf16>, vector<4x8x8xbf16>, vector<4x8x8xf32> -> vector<4x8x8xf32>
    "tpu.trace_stop"() : () -> ()
    %cst_11 = arith.constant 0.353553385 : f32
    %20 = vector.broadcast %cst_11 : f32 to vector<4x8x8xf32>
    %21 = arith.mulf %19, %20 : vector<4x8x8xf32>
    %cst_12 = arith.constant dense<0xFF800000> : vector<4x8xf32>
    %22 = vector.multi_reduction <maximumf>, %21, %cst_12 [2] : vector<4x8x8xf32> to vector<4x8xf32>
    %23 = vector.shape_cast %22 : vector<4x8xf32> to vector<4x8x1xf32>
    %24 = vector.broadcast %23 : vector<4x8x1xf32> to vector<4x8x8xf32>
    %25 = arith.subf %21, %24 : vector<4x8x8xf32>
    %26 = math.exp %25 : vector<4x8x8xf32>
    %cst_13 = arith.constant dense<0.000000e+00> : vector<4x8xf32>
    %27 = vector.multi_reduction <add>, %26, %cst_13 [2] : vector<4x8x8xf32> to vector<4x8xf32>
    %28 = vector.shape_cast %27 : vector<4x8xf32> to vector<4x8x1xf32>
    %29 = tpu.reciprocal %28 {approx = true} : vector<4x8x1xf32> -> vector<4x8x1xf32>
    %30 = vector.broadcast %29 : vector<4x8x1xf32> to vector<4x8x8xf32>
    %31 = arith.mulf %26, %30 : vector<4x8x8xf32>
    %32 = arith.truncf %31 : vector<4x8x8xf32> to vector<4x8x8xbf16>
    %33 = arith.truncf %16 : vector<4x8x8xf32> to vector<4x8x8xbf16>
    "tpu.trace_start"() <{level = 10 : i32, message = "hqk,hkd->hqd"}> : () -> ()
    %cst_14 = arith.constant dense<0.000000e+00> : vector<4x8x8xf32>
    %34 = tpu.matmul %32, %33, %cst_14 {dimension_numbers = #tpu.dot_dimension_numbers<[2], [1], [1], [2], [0, 0, 0, 1, 1, 2], [0], [0]>} : vector<4x8x8xbf16>, vector<4x8x8xbf16>, vector<4x8x8xf32> -> vector<4x8x8xf32>
    "tpu.trace_stop"() : () -> ()
    %35 = arith.truncf %34 : vector<4x8x8xf32> to vector<4x8x8xbf16>
    %c0_15 = arith.constant 0 : index
    %c0_16 = arith.constant 0 : index
    %c0_17 = arith.constant 0 : index
    %c0_18 = arith.constant 0 : index
    %36 = vector.load %arg5[%c0_15, %c0_16, %c0_17, %c0_18] : memref<1x4x8x32xbf16, #tpu.memory_space<vmem>>, vector<1x4x8x32xbf16>
    %37 = vector.shape_cast %36 : vector<1x4x8x32xbf16> to vector<4x8x32xbf16>
    "tpu.trace_start"() <{level = 10 : i32, message = "hsd,hde->hse"}> : () -> ()
    %cst_19 = arith.constant dense<0.000000e+00> : vector<4x8x32xf32>
    %38 = tpu.matmul %35, %37, %cst_19 {dimension_numbers = #tpu.dot_dimension_numbers<[2], [1], [1], [2], [0, 0, 0, 1, 1, 2], [0], [0]>} : vector<4x8x8xbf16>, vector<4x8x32xbf16>, vector<4x8x32xf32> -> vector<4x8x32xf32>
    "tpu.trace_stop"() : () -> ()
    %cst_20 = arith.constant dense<0.000000e+00> : vector<8x32xf32>
    %39 = vector.multi_reduction <add>, %38, %cst_20 [0] : vector<4x8x32xf32> to vector<8x32xf32>
    %c0_21 = arith.constant 0 : index
    %c0_22 = arith.constant 0 : index
    %c0_23 = arith.constant 0 : index
    %40 = vector.load %arg6[%c0_21, %c0_22, %c0_23] : memref<1x1x32xf32, #tpu.memory_space<vmem>>, vector<1x1x32xf32>
    %41 = vector.shape_cast %40 : vector<1x1x32xf32> to vector<1x32xf32>
    %42 = vector.broadcast %41 : vector<1x32xf32> to vector<8x32xf32>
    %43 = arith.addf %39, %42 : vector<8x32xf32>
    %44 = arith.addf %3, %43 : vector<8x32xf32>
    %c0_24 = arith.constant 0 : index
    %c0_25 = arith.constant 0 : index
    %c0_26 = arith.constant 0 : index
    %45 = vector.load %arg7[%c0_24, %c0_25, %c0_26] : memref<1x1x32xf32, #tpu.memory_space<vmem>>, vector<1x1x32xf32>
    %46 = vector.shape_cast %45 : vector<1x1x32xf32> to vector<1x32xf32>
    %c0_27 = arith.constant 0 : index
    %c0_28 = arith.constant 0 : index
    %c0_29 = arith.constant 0 : index
    %47 = vector.load %arg8[%c0_27, %c0_28, %c0_29] : memref<1x1x32xf32, #tpu.memory_space<vmem>>, vector<1x1x32xf32>
    %48 = vector.shape_cast %47 : vector<1x1x32xf32> to vector<1x32xf32>
    %cst_30 = arith.constant dense<0.000000e+00> : vector<8xf32>
    %49 = vector.multi_reduction <add>, %44, %cst_30 [1] : vector<8x32xf32> to vector<8xf32>
    %50 = vector.shape_cast %49 : vector<8xf32> to vector<8x1xf32>
    %cst_31 = arith.constant 3.200000e+01 : f32
    %51 = vector.broadcast %cst_31 : f32 to vector<8x1xf32>
    %52 = arith.divf %50, %51 : vector<8x1xf32>
    %53 = vector.broadcast %52 : vector<8x1xf32> to vector<8x32xf32>
    %54 = arith.subf %44, %53 : vector<8x32xf32>
    %55 = arith.mulf %54, %54 : vector<8x32xf32>
    %cst_32 = arith.constant dense<0.000000e+00> : vector<8xf32>
    %56 = vector.multi_reduction <add>, %55, %cst_32 [1] : vector<8x32xf32> to vector<8xf32>
    %57 = vector.shape_cast %56 : vector<8xf32> to vector<8x1xf32>
    %cst_33 = arith.constant 3.200000e+01 : f32
    %58 = vector.broadcast %cst_33 : f32 to vector<8x1xf32>
    %59 = arith.divf %57, %58 : vector<8x1xf32>
    %60 = vector.broadcast %52 : vector<8x1xf32> to vector<8x32xf32>
    %61 = arith.subf %44, %60 : vector<8x32xf32>
    %cst_34 = arith.constant 9.99999974E-6 : f32
    %62 = vector.broadcast %cst_34 : f32 to vector<8x1xf32>
    %63 = arith.addf %59, %62 : vector<8x1xf32>
    %64 = math.rsqrt %63 : vector<8x1xf32>
    %65 = vector.broadcast %64 : vector<8x1xf32> to vector<8x32xf32>
    %66 = arith.mulf %61, %65 : vector<8x32xf32>
    %67 = vector.broadcast %46 : vector<1x32xf32> to vector<8x32xf32>
    %68 = arith.mulf %66, %67 : vector<8x32xf32>
    %69 = vector.broadcast %48 : vector<1x32xf32> to vector<8x32xf32>
    %70 = arith.addf %68, %69 : vector<8x32xf32>
    %71 = arith.truncf %70 : vector<8x32xf32> to vector<8x32xbf16>
    %cst_35 = arith.constant 0.000000e+00 : f32
    %72 = vector.broadcast %cst_35 : f32 to vector<8x32xf32>
    %c0_36 = arith.constant 0 : index
    %c0_37 = arith.constant 0 : index
    %c0_38 = arith.constant 0 : index
    %73 = vector.load %arg9[%c0_36, %c0_37, %c0_38] : memref<1x32x2048xbf16, #tpu.memory_space<vmem>>, vector<1x32x512xbf16>
    %74 = vector.shape_cast %73 : vector<1x32x512xbf16> to vector<32x512xbf16>
    %c0_39 = arith.constant 0 : index
    %c0_40 = arith.constant 0 : index
    %c0_41 = arith.constant 0 : index
    %75 = vector.load %arg10[%c0_39, %c0_40, %c0_41] : memref<1x1x2048xf32, #tpu.memory_space<vmem>>, vector<1x1x512xf32>
    %76 = vector.shape_cast %75 : vector<1x1x512xf32> to vector<1x512xf32>
    %cst_42 = arith.constant dense<0.000000e+00> : vector<8x512xf32>
    %77 = tpu.matmul %71, %74, %cst_42 {dimension_numbers = #tpu.dot_dimension_numbers<[1], [0], [0], [1], [0, 0, 1, 1], [], []>} : vector<8x32xbf16>, vector<32x512xbf16>, vector<8x512xf32> -> vector<8x512xf32>
    %78 = vector.broadcast %76 : vector<1x512xf32> to vector<8x512xf32>
    %79 = arith.addf %77, %78 : vector<8x512xf32>
    %cst_43 = arith.constant 0.000000e+00 : f32
    %80 = vector.broadcast %cst_43 : f32 to vector<8x512xf32>
    %81 = arith.maximumf %79, %80 : vector<8x512xf32>
    %c0_44 = arith.constant 0 : index
    %c0_45 = arith.constant 0 : index
    %c0_46 = arith.constant 0 : index
    %82 = vector.load %arg11[%c0_44, %c0_45, %c0_46] : memref<1x2048x32xbf16, #tpu.memory_space<vmem>>, vector<1x512x32xbf16>
    %83 = vector.shape_cast %82 : vector<1x512x32xbf16> to vector<512x32xbf16>
    %84 = arith.truncf %81 : vector<8x512xf32> to vector<8x512xbf16>
    %cst_47 = arith.constant dense<0.000000e+00> : vector<8x32xf32>
    %85 = tpu.matmul %84, %83, %cst_47 {dimension_numbers = #tpu.dot_dimension_numbers<[1], [0], [0], [1], [0, 0, 1, 1], [], []>} : vector<8x512xbf16>, vector<512x32xbf16>, vector<8x32xf32> -> vector<8x32xf32>
    %86 = arith.addf %72, %85 : vector<8x32xf32>
    %c0_48 = arith.constant 0 : index
    %c0_49 = arith.constant 0 : index
    %c512 = arith.constant 512 : index
    %87 = vector.load %arg9[%c0_48, %c0_49, %c512] : memref<1x32x2048xbf16, #tpu.memory_space<vmem>>, vector<1x32x512xbf16>
    %88 = vector.shape_cast %87 : vector<1x32x512xbf16> to vector<32x512xbf16>
    %c0_50 = arith.constant 0 : index
    %c0_51 = arith.constant 0 : index
    %c512_52 = arith.constant 512 : index
    %89 = vector.load %arg10[%c0_50, %c0_51, %c512_52] : memref<1x1x2048xf32, #tpu.memory_space<vmem>>, vector<1x1x512xf32>
    %90 = vector.shape_cast %89 : vector<1x1x512xf32> to vector<1x512xf32>
    %cst_53 = arith.constant dense<0.000000e+00> : vector<8x512xf32>
    %91 = tpu.matmul %71, %88, %cst_53 {dimension_numbers = #tpu.dot_dimension_numbers<[1], [0], [0], [1], [0, 0, 1, 1], [], []>} : vector<8x32xbf16>, vector<32x512xbf16>, vector<8x512xf32> -> vector<8x512xf32>
    %92 = vector.broadcast %90 : vector<1x512xf32> to vector<8x512xf32>
    %93 = arith.addf %91, %92 : vector<8x512xf32>
    %cst_54 = arith.constant 0.000000e+00 : f32
    %94 = vector.broadcast %cst_54 : f32 to vector<8x512xf32>
    %95 = arith.maximumf %93, %94 : vector<8x512xf32>
    %c0_55 = arith.constant 0 : index
    %c512_56 = arith.constant 512 : index
    %c0_57 = arith.constant 0 : index
    %96 = vector.load %arg11[%c0_55, %c512_56, %c0_57] : memref<1x2048x32xbf16, #tpu.memory_space<vmem>>, vector<1x512x32xbf16>
    %97 = vector.shape_cast %96 : vector<1x512x32xbf16> to vector<512x32xbf16>
    %98 = arith.truncf %95 : vector<8x512xf32> to vector<8x512xbf16>
    %cst_58 = arith.constant dense<0.000000e+00> : vector<8x32xf32>
    %99 = tpu.matmul %98, %97, %cst_58 {dimension_numbers = #tpu.dot_dimension_numbers<[1], [0], [0], [1], [0, 0, 1, 1], [], []>} : vector<8x512xbf16>, vector<512x32xbf16>, vector<8x32xf32> -> vector<8x32xf32>
    %100 = arith.addf %86, %99 : vector<8x32xf32>
    %c0_59 = arith.constant 0 : index
    %c0_60 = arith.constant 0 : index
    %c1024 = arith.constant 1024 : index
    %101 = vector.load %arg9[%c0_59, %c0_60, %c1024] : memref<1x32x2048xbf16, #tpu.memory_space<vmem>>, vector<1x32x512xbf16>
    %102 = vector.shape_cast %101 : vector<1x32x512xbf16> to vector<32x512xbf16>
    %c0_61 = arith.constant 0 : index
    %c0_62 = arith.constant 0 : index
    %c1024_63 = arith.constant 1024 : index
    %103 = vector.load %arg10[%c0_61, %c0_62, %c1024_63] : memref<1x1x2048xf32, #tpu.memory_space<vmem>>, vector<1x1x512xf32>
    %104 = vector.shape_cast %103 : vector<1x1x512xf32> to vector<1x512xf32>
    %cst_64 = arith.constant dense<0.000000e+00> : vector<8x512xf32>
    %105 = tpu.matmul %71, %102, %cst_64 {dimension_numbers = #tpu.dot_dimension_numbers<[1], [0], [0], [1], [0, 0, 1, 1], [], []>} : vector<8x32xbf16>, vector<32x512xbf16>, vector<8x512xf32> -> vector<8x512xf32>
    %106 = vector.broadcast %104 : vector<1x512xf32> to vector<8x512xf32>
    %107 = arith.addf %105, %106 : vector<8x512xf32>
    %cst_65 = arith.constant 0.000000e+00 : f32
    %108 = vector.broadcast %cst_65 : f32 to vector<8x512xf32>
    %109 = arith.maximumf %107, %108 : vector<8x512xf32>
    %c0_66 = arith.constant 0 : index
    %c1024_67 = arith.constant 1024 : index
    %c0_68 = arith.constant 0 : index
    %110 = vector.load %arg11[%c0_66, %c1024_67, %c0_68] : memref<1x2048x32xbf16, #tpu.memory_space<vmem>>, vector<1x512x32xbf16>
    %111 = vector.shape_cast %110 : vector<1x512x32xbf16> to vector<512x32xbf16>
    %112 = arith.truncf %109 : vector<8x512xf32> to vector<8x512xbf16>
    %cst_69 = arith.constant dense<0.000000e+00> : vector<8x32xf32>
    %113 = tpu.matmul %112, %111, %cst_69 {dimension_numbers = #tpu.dot_dimension_numbers<[1], [0], [0], [1], [0, 0, 1, 1], [], []>} : vector<8x512xbf16>, vector<512x32xbf16>, vector<8x32xf32> -> vector<8x32xf32>
    %114 = arith.addf %100, %113 : vector<8x32xf32>
    %c0_70 = arith.constant 0 : index
    %c0_71 = arith.constant 0 : index
    %c1536 = arith.constant 1536 : index
    %115 = vector.load %arg9[%c0_70, %c0_71, %c1536] : memref<1x32x2048xbf16, #tpu.memory_space<vmem>>, vector<1x32x512xbf16>
    %116 = vector.shape_cast %115 : vector<1x32x512xbf16> to vector<32x512xbf16>
    %c0_72 = arith.constant 0 : index
    %c0_73 = arith.constant 0 : index
    %c1536_74 = arith.constant 1536 : index
    %117 = vector.load %arg10[%c0_72, %c0_73, %c1536_74] : memref<1x1x2048xf32, #tpu.memory_space<vmem>>, vector<1x1x512xf32>
    %118 = vector.shape_cast %117 : vector<1x1x512xf32> to vector<1x512xf32>
    %cst_75 = arith.constant dense<0.000000e+00> : vector<8x512xf32>
    %119 = tpu.matmul %71, %116, %cst_75 {dimension_numbers = #tpu.dot_dimension_numbers<[1], [0], [0], [1], [0, 0, 1, 1], [], []>} : vector<8x32xbf16>, vector<32x512xbf16>, vector<8x512xf32> -> vector<8x512xf32>
    %120 = vector.broadcast %118 : vector<1x512xf32> to vector<8x512xf32>
    %121 = arith.addf %119, %120 : vector<8x512xf32>
    %cst_76 = arith.constant 0.000000e+00 : f32
    %122 = vector.broadcast %cst_76 : f32 to vector<8x512xf32>
    %123 = arith.maximumf %121, %122 : vector<8x512xf32>
    %c0_77 = arith.constant 0 : index
    %c1536_78 = arith.constant 1536 : index
    %c0_79 = arith.constant 0 : index
    %124 = vector.load %arg11[%c0_77, %c1536_78, %c0_79] : memref<1x2048x32xbf16, #tpu.memory_space<vmem>>, vector<1x512x32xbf16>
    %125 = vector.shape_cast %124 : vector<1x512x32xbf16> to vector<512x32xbf16>
    %126 = arith.truncf %123 : vector<8x512xf32> to vector<8x512xbf16>
    %cst_80 = arith.constant dense<0.000000e+00> : vector<8x32xf32>
    %127 = tpu.matmul %126, %125, %cst_80 {dimension_numbers = #tpu.dot_dimension_numbers<[1], [0], [0], [1], [0, 0, 1, 1], [], []>} : vector<8x512xbf16>, vector<512x32xbf16>, vector<8x32xf32> -> vector<8x32xf32>
    %128 = arith.addf %114, %127 : vector<8x32xf32>
    %c0_81 = arith.constant 0 : index
    %c0_82 = arith.constant 0 : index
    %c0_83 = arith.constant 0 : index
    %129 = vector.load %arg12[%c0_81, %c0_82, %c0_83] : memref<1x1x32xf32, #tpu.memory_space<vmem>>, vector<1x1x32xf32>
    %130 = vector.shape_cast %129 : vector<1x1x32xf32> to vector<1x32xf32>
    %131 = vector.broadcast %130 : vector<1x32xf32> to vector<8x32xf32>
    %132 = arith.addf %128, %131 : vector<8x32xf32>
    %133 = arith.addf %70, %132 : vector<8x32xf32>
    %c0_84 = arith.constant 0 : index
    %c0_85 = arith.constant 0 : index
    %c0_86 = arith.constant 0 : index
    %134 = vector.load %arg13[%c0_84, %c0_85, %c0_86] : memref<1x1x32xf32, #tpu.memory_space<vmem>>, vector<1x1x32xf32>
    %135 = vector.shape_cast %134 : vector<1x1x32xf32> to vector<1x32xf32>
    %c0_87 = arith.constant 0 : index
    %c0_88 = arith.constant 0 : index
    %c0_89 = arith.constant 0 : index
    %136 = vector.load %arg14[%c0_87, %c0_88, %c0_89] : memref<1x1x32xf32, #tpu.memory_space<vmem>>, vector<1x1x32xf32>
    %137 = vector.shape_cast %136 : vector<1x1x32xf32> to vector<1x32xf32>
    %cst_90 = arith.constant dense<0.000000e+00> : vector<8xf32>
    %138 = vector.multi_reduction <add>, %133, %cst_90 [1] : vector<8x32xf32> to vector<8xf32>
    %139 = vector.shape_cast %138 : vector<8xf32> to vector<8x1xf32>
    %cst_91 = arith.constant 3.200000e+01 : f32
    %140 = vector.broadcast %cst_91 : f32 to vector<8x1xf32>
    %141 = arith.divf %139, %140 : vector<8x1xf32>
    %142 = vector.broadcast %141 : vector<8x1xf32> to vector<8x32xf32>
    %143 = arith.subf %133, %142 : vector<8x32xf32>
    %144 = arith.mulf %143, %143 : vector<8x32xf32>
    %cst_92 = arith.constant dense<0.000000e+00> : vector<8xf32>
    %145 = vector.multi_reduction <add>, %144, %cst_92 [1] : vector<8x32xf32> to vector<8xf32>
    %146 = vector.shape_cast %145 : vector<8xf32> to vector<8x1xf32>
    %cst_93 = arith.constant 3.200000e+01 : f32
    %147 = vector.broadcast %cst_93 : f32 to vector<8x1xf32>
    %148 = arith.divf %146, %147 : vector<8x1xf32>
    %149 = vector.broadcast %141 : vector<8x1xf32> to vector<8x32xf32>
    %150 = arith.subf %133, %149 : vector<8x32xf32>
    %cst_94 = arith.constant 9.99999974E-6 : f32
    %151 = vector.broadcast %cst_94 : f32 to vector<8x1xf32>
    %152 = arith.addf %148, %151 : vector<8x1xf32>
    %153 = math.rsqrt %152 : vector<8x1xf32>
    %154 = vector.broadcast %153 : vector<8x1xf32> to vector<8x32xf32>
    %155 = arith.mulf %150, %154 : vector<8x32xf32>
    %156 = vector.broadcast %135 : vector<1x32xf32> to vector<8x32xf32>
    %157 = arith.mulf %155, %156 : vector<8x32xf32>
    %158 = vector.broadcast %137 : vector<1x32xf32> to vector<8x32xf32>
    %159 = arith.addf %157, %158 : vector<8x32xf32>
    %c0_95 = arith.constant 0 : index
    %c0_96 = arith.constant 0 : index
    %160 = vector.load %arg18[%c0_95, %c0_96] : memref<8x32xf32, #tpu.memory_space<vmem>>, vector<8x32xf32>
    tpu.vector_store %arg18[%c0_95, %c0_96], %159 {strides = array<i32>} : memref<8x32xf32, #tpu.memory_space<vmem>>, vector<8x32xf32>,
    %c1_i32 = arith.constant 1 : i32
    %161 = arith.cmpi eq, %arg1, %c1_i32 : i32
    %162 = arith.extui %161 : i1 to i32
    %c0_i32_97 = arith.constant 0 : i32
    %163 = arith.cmpi ne, %162, %c0_i32_97 : i32
    scf.if %163 {
      %c0_98 = arith.constant 0 : index
      %c0_99 = arith.constant 0 : index
      %164 = vector.load %arg18[%c0_98, %c0_99] : memref<8x32xf32, #tpu.memory_space<vmem>>, vector<8x32xf32>
      %cst_100 = arith.constant dense<0.000000e+00> : vector<32xf32>
      %165 = vector.multi_reduction <add>, %164, %cst_100 [0] : vector<8x32xf32> to vector<32xf32>
      %166 = vector.shape_cast %165 : vector<32xf32> to vector<1x32xf32>
      %cst_101 = arith.constant 8.000000e+00 : f32
      %167 = vector.broadcast %cst_101 : f32 to vector<1x32xf32>
      %168 = arith.divf %166, %167 : vector<1x32xf32>
      %169 = arith.truncf %168 : vector<1x32xf32> to vector<1x32xbf16>
      %c0_102 = arith.constant 0 : index
      %c0_103 = arith.constant 0 : index
      %170 = vector.load %arg15[%c0_102, %c0_103] : memref<32x128xbf16, #tpu.memory_space<vmem>>, vector<32x128xbf16>
      %cst_104 = arith.constant dense<0.000000e+00> : vector<1x128xf32>
      %171 = tpu.matmul %169, %170, %cst_104 {dimension_numbers = #tpu.dot_dimension_numbers<[1], [0], [0], [1], [0, 0, 1, 1], [], []>} : vector<1x32xbf16>, vector<32x128xbf16>, vector<1x128xf32> -> vector<1x128xf32>
      %c0_105 = arith.constant 0 : index
      %c0_106 = arith.constant 0 : index
      %172 = vector.load %arg16[%c0_105, %c0_106] : memref<1x128xf32, #tpu.memory_space<vmem>>, vector<1x128xf32>
      %173 = arith.addf %171, %172 : vector<1x128xf32>
      %c0_107 = arith.constant 0 : index
      %c0_108 = arith.constant 0 : index
      %c0_109 = arith.constant 0 : index
      %174 = vector.load %arg17[%c0_107, %c0_108, %c0_109] : memref<1x1x128xf32, #tpu.memory_space<vmem>>, vector<1x1x128xf32>
      %175 = vector.shape_cast %174 : vector<1x1x128xf32> to vector<1x128xf32>
      %176 = vector.shape_cast %173 : vector<1x128xf32> to vector<1x1x128xf32>
      tpu.vector_store %arg17[%c0_107, %c0_108, %c0_109], %176 {strides = array<i32>} : memref<1x1x128xf32, #tpu.memory_space<vmem>>, vector<1x1x128xf32>,
    } else {
    }
    return
  }
  func.func @transform_0(%arg0: i32, %arg1: i32) -> (i32, i32, i32) {
    %c0_i32 = arith.constant 0 : i32
    %c0_i32_0 = arith.constant 0 : i32
    %c0_i32_1 = arith.constant 0 : i32
    return %arg0, %c0_i32, %c0_i32_0 : i32, i32, i32
  }
  func.func @transform_1(%arg0: i32, %arg1: i32) -> (i32, i32, i32, i32) {
    %c0_i32 = arith.constant 0 : i32
    %c0_i32_0 = arith.constant 0 : i32
    %c0_i32_1 = arith.constant 0 : i32
    %c0_i32_2 = arith.constant 0 : i32
    return %arg1, %c0_i32, %c0_i32_0, %c0_i32_1 : i32, i32, i32, i32
  }
  func.func @transform_2(%arg0: i32, %arg1: i32) -> (i32, i32, i32, i32) {
    %c0_i32 = arith.constant 0 : i32
    %c0_i32_0 = arith.constant 0 : i32
    %c0_i32_1 = arith.constant 0 : i32
    %c0_i32_2 = arith.constant 0 : i32
    return %arg1, %c0_i32, %c0_i32_0, %c0_i32_1 : i32, i32, i32, i32
  }
  func.func @transform_3(%arg0: i32, %arg1: i32) -> (i32, i32, i32, i32) {
    %c0_i32 = arith.constant 0 : i32
    %c0_i32_0 = arith.constant 0 : i32
    %c0_i32_1 = arith.constant 0 : i32
    %c0_i32_2 = arith.constant 0 : i32
    return %arg1, %c0_i32, %c0_i32_0, %c0_i32_1 : i32, i32, i32, i32
  }
  func.func @transform_4(%arg0: i32, %arg1: i32) -> (i32, i32, i32) {
    %c0_i32 = arith.constant 0 : i32
    %c0_i32_0 = arith.constant 0 : i32
    %c0_i32_1 = arith.constant 0 : i32
    return %arg1, %c0_i32, %c0_i32_0 : i32, i32, i32
  }
  func.func @transform_5(%arg0: i32, %arg1: i32) -> (i32, i32, i32) {
    %c0_i32 = arith.constant 0 : i32
    %c0_i32_0 = arith.constant 0 : i32
    %c0_i32_1 = arith.constant 0 : i32
    return %arg1, %c0_i32, %c0_i32_0 : i32, i32, i32
  }
  func.func @transform_6(%arg0: i32, %arg1: i32) -> (i32, i32, i32) {
    %c0_i32 = arith.constant 0 : i32
    %c0_i32_0 = arith.constant 0 : i32
    %c0_i32_1 = arith.constant 0 : i32
    return %arg1, %c0_i32, %c0_i32_0 : i32, i32, i32
  }
  func.func @transform_7(%arg0: i32, %arg1: i32) -> (i32, i32, i32) {
    %c0_i32 = arith.constant 0 : i32
    %c0_i32_0 = arith.constant 0 : i32
    %c0_i32_1 = arith.constant 0 : i32
    return %arg1, %c0_i32, %c0_i32_0 : i32, i32, i32
  }
  func.func @transform_8(%arg0: i32, %arg1: i32) -> (i32, i32, i32) {
    %c0_i32 = arith.constant 0 : i32
    %c0_i32_0 = arith.constant 0 : i32
    %c0_i32_1 = arith.constant 0 : i32
    return %arg1, %c0_i32, %c0_i32_0 : i32, i32, i32
  }
  func.func @transform_9(%arg0: i32, %arg1: i32) -> (i32, i32, i32) {
    %c0_i32 = arith.constant 0 : i32
    %c0_i32_0 = arith.constant 0 : i32
    %c0_i32_1 = arith.constant 0 : i32
    return %arg1, %c0_i32, %c0_i32_0 : i32, i32, i32
  }
  func.func @transform_10(%arg0: i32, %arg1: i32) -> (i32, i32, i32) {
    %c0_i32 = arith.constant 0 : i32
    %c0_i32_0 = arith.constant 0 : i32
    %c0_i32_1 = arith.constant 0 : i32
    return %arg1, %c0_i32, %c0_i32_0 : i32, i32, i32
  }
  func.func @transform_11(%arg0: i32, %arg1: i32) -> (i32, i32, i32) {
    %c0_i32 = arith.constant 0 : i32
    %c0_i32_0 = arith.constant 0 : i32
    %c0_i32_1 = arith.constant 0 : i32
    return %arg1, %c0_i32, %c0_i32_0 : i32, i32, i32
  }
  func.func @transform_12(%arg0: i32, %arg1: i32) -> (i32, i32, i32) {
    %c0_i32 = arith.constant 0 : i32
    %c0_i32_0 = arith.constant 0 : i32
    %c0_i32_1 = arith.constant 0 : i32
    return %arg1, %c0_i32, %c0_i32_0 : i32, i32, i32
  }
  func.func @transform_13(%arg0: i32, %arg1: i32) -> (i32, i32) {
    %c0_i32 = arith.constant 0 : i32
    %c0_i32_0 = arith.constant 0 : i32
    %c0_i32_1 = arith.constant 0 : i32
    return %c0_i32, %c0_i32_0 : i32, i32
  }
  func.func @transform_14(%arg0: i32, %arg1: i32) -> (i32, i32) {
    %c0_i32 = arith.constant 0 : i32
    %c0_i32_0 = arith.constant 0 : i32
    %c0_i32_1 = arith.constant 0 : i32
    return %c0_i32, %c0_i32_0 : i32, i32
  }
  func.func @transform_15(%arg0: i32, %arg1: i32) -> (i32, i32, i32) {
    %c0_i32 = arith.constant 0 : i32
    %c0_i32_0 = arith.constant 0 : i32
    %c0_i32_1 = arith.constant 0 : i32
    return %arg0, %c0_i32, %c0_i32_0 : i32, i32, i32
  }
}

</mosaic_0001>

<bundles_post_ra>
// kernel: tpu_custom_call.1
= control target key start
LH: loop header
LB: loop body
LE: loop exit
PB: predicated region body
PF: predicated region fallthrough
CT: control target
= control target key end

     0   :  { %s5349_s0 = inlined_call_operand.vmem [shape: f32[2,8,32], index: 0, kind: input, shape index: {}]   ;;  %s5350_s1 = inlined_call_operand.vmem [shape: bf16[2,12,32,8], index: 1, kind: input, shape index: {}]   ;;  %s5351_s2 = inlined_call_operand.vmem [shape: f32[2,12,1,8], index: 2, kind: input, shape index: {}]   ;;  %s5352_s3 = inlined_call_operand.vmem [shape: bf16[2,4,8,32], index: 3, kind: input, shape index: {}]   ;;  %s5353_s4 = inlined_call_operand.vmem [shape: f32[2,1,32], index: 4, kind: input, shape index: {}]   ;;  %s5354_s5 = inlined_call_operand.vmem [shape: f32[2,1,32], index: 5, kind: input, shape index: {}]   ;;  %s5355_s6 = inlined_call_operand.vmem [shape: f32[2,1,32], index: 6, kind: input, shape index: {}]   ;;  %s5356_s7 = inlined_call_operand.vmem [shape: bf16[2,32,2048], index: 7, kind: input, shape index: {}]   ;;  %s5357_s8 = inlined_call_operand.vmem [shape: f32[2,1,2048], index: 8, kind: input, shape index: {}]   ;;  %s5358_s9 = inlined_call_operand.vmem [shape: bf16[2,2048,32], index: 9, kind: input, shape index: {}]   ;;  %s5359_s10 = inlined_call_operand.vmem [shape: f32[2,1,32], index: 10, kind: input, shape index: {}]   ;;  %s5360_s11 = inlined_call_operand.vmem [shape: f32[2,1,32], index: 11, kind: input, shape index: {}]   ;;  %s5361_s12 = inlined_call_operand.vmem [shape: f32[2,1,32], index: 12, kind: input, shape index: {}]   ;;  %s5362_s13 = inlined_call_operand.vmem [shape: bf16[32,128], index: 13, kind: input, shape index: {}]   ;;  %s5363_s14 = inlined_call_operand.vmem [shape: f32[1,128], index: 14, kind: input, shape index: {}]   ;;  %s5364_s15 = inlined_call_operand.hbm [shape: f32[2,1,128], index: 15, kind: output, shape index: {}]  }
   0x1   :  { %5380 = sst [smem:[#allocation19_spill]] %s5349_s0 }
   0x2   :  { %5381 = sst [smem:[#allocation20_spill]] %s5350_s1 }
   0x3   :  { %5382 = sst [smem:[#allocation21_spill]] %s5351_s2 }
   0x4   :  { %5383 = sst [smem:[#allocation22_spill]] %s5352_s3 }
   0x5   :  { %5384 = sst [smem:[#allocation23_spill]] %s5356_s7 }
   0x6   :  { %5385 = sst [smem:[#allocation24_spill]] %s5361_s12 }
   0x7   :  { %5386 = sst [smem:[#allocation25_spill]] %s5362_s13 }
   0x8   :  { %5387 = sst [smem:[#allocation26_spill]] %s5363_s14 }
   0x9   :  { %5388 = sst [smem:[#allocation27_spill]] %s5364_s15 }
   0xa   :  { %20 = vsyncpa [#allocation4], 0 }
   0xb   :  { %22 = vsyncpa [#allocation4 + $0x1], 0  ;;  %s4759_s18 = smov 0   ;;  %s4761_s19 = smov 0  }
   0xc   :  { %s4763_s20 = smov 0   ;;  %s4765_s21 = smov 0  }
   0xd   :  { %s4767_s22 = smov 0   ;;  %s4769_s23 = smov 0  }
   0xe   :  { %s4771_s24 = smov 0   ;;  %s4773_s25 = smov 0  }
   0xf LB: > { %5389 = sst [smem:[#allocation6_spill]] %s4647_s18  ;;  %s3472_s26 = sadd.s32 4294967295, %s4675_s25   ;;  %s4675_s25 = sphi %s4773_s25, %s28_s25   ;;  %s4671_s24 = sphi %s4771_s24, %s5433_s24   ;;  %s4667_s23 = sphi %s4769_s23, %s5432_s23   ;;  %s4663_s22 = sphi %s4767_s22, %s5431_s22   ;;  %s4659_s21 = sphi %s4765_s21, %s5430_s21   ;;  %s4655_s20 = sphi %s4763_s20, %s5429_s20   ;;  %s4651_s19 = sphi %s4761_s19, %s5435_s19   ;;  %s4647_s18 = sphi %s4759_s18, %s5434_s18  }
  0x10   : > { %5390 = sst [smem:[#allocation7_spill]] %s4655_s20  ;;  %s3473_s27 = sadd.s32 4294967294, %s4675_s25  }
  0x11   : > { %5391 = sst [smem:[#allocation8_spill]] %s4659_s21  ;;  %s37_s28 = sadd.s32 1, %s4667_s23 }
  0x12   : > { %5392 = sst [smem:[#allocation9_spill]] %s4663_s22  ;;  %p38_p0 = scmp.ge.s32.totalorder %s37_s28, 2 }
  0x13   : > { %5393 = sst [smem:[#allocation10_spill]] %s4667_s23  ;;  %s40_s29 = sadd.s32 1, %s4671_s24 }
  0x14   : > { %5394 = sst [smem:[#allocation11_spill]] %s4671_s24  ;;  %p437_p1 = scmp.ne.s32.totalorder %s4655_s20, %s4651_s19 }
  0x15   : > { %5395 = sst [smem:[#allocation12_spill]] %s4675_s25  ;;  %p438_p2 = scmp.eq.s32.totalorder %s3472_s26, 3 }
  0x16   : > { %s5437_s28 = smov (%p38_p0, %s37_s28), 0  ;;  %s5439_s29 = smov (!%p38_p0, %s40_s29), %s4671_s24 }
  0x17   : > { %5396 = sst [smem:[#allocation13_spill]] %s5437_s28  ;;  %p4808_p3 = por %p438_p2, %p437_p1 }
  0x18   : > { %p443_p4 = scmp.ne.s32.totalorder %s4651_s19, %s4647_s18  ;;  %p42_p5 = scmp.ge.s32.totalorder %s5439_s29, 2 }
  0x19   : > { %s5397_s30 = scalar_select %p4808_p3, 1, 0 }
  0x1a   : > { %p444_p6 = scmp.eq.s32.totalorder %s3473_s27, 3  ;;  %p3476_p7 = scmp.ge.s32.totalorder %s4675_s25, 1 }
  0x1b   : > { %5398 = sst [smem:[#allocation14_spill]] %s5397_s30  ;;  %p557_p8 = scmp.lt.s32.totalorder %s4675_s25, 5 }
  0x1c   : > { %s5441_s29 = smov (%p42_p5, %s5439_s29), 0  ;;  %p4818_p9 = por %p444_p6, %p443_p4 }
  0x1d   : > { %5399 = sst [smem:[#allocation15_spill]] %s5441_s29  ;;  %p558_p10 = pnand %p3476_p7, %p557_p8 }
  0x1e   : > { %s5400_s16 = scalar_select %p4818_p9, 1, 0 }
  0x1f   : > { %s424_s17 = ssub.s32 %s4671_s24, %s5441_s29  ;;  %s427_s26 = sadd.s32 1, %s4655_s20 }
  0x20   : > { %5401 = sst [smem:[#allocation16_spill]] %s5400_s16  ;;  %p425_p11 = scmp.eq.s32.totalorder %s424_s17, 0 }
  0x21   : > { %561 = sbr.rel (%p558_p10) target bundleno = 2250 (0x8ca), region = 80 }
  0x22   : > { %s4826_s28 = scalar_select %p425_p11, %s4655_s20, %s427_s26  }
  0x24   : > { %5402 = sst [smem:[#allocation17_spill]] %s4826_s28 }
  0x26   : > { %p649_p12 = scmp.lt.s32.totalorder %s4663_s22, 1  ;;  %p653_p13 = scmp.lt.s32.totalorder %s4659_s21, 1 }
  0x27   : > { %s5403_s0 = sld [smem:[#allocation19_spill]] }
  0x28   : > { %s650_s23 = scalar_select %p649_p12, %s4663_s22, 1 }
  0x29   : > { %s4833_s18 = scalar_select %p653_p13, %s4659_s21, 1 }
  0x2a   : > { %s3477_s17 = sshll.u32 %s650_s23, 3  ;;  %s5404_s1 = sld [smem:[#allocation20_spill]] }
  0x2b   : > { %s4464_s27 = smul.u32 192, %s4833_s18  ;;  %s4275_s20 = sshll.u32 %s4833_s18, 4 }
  0x2c   : > { %s4465_s28 = smul.u32 12, %s4833_s18  ;;  %s5405_s3 = sld [smem:[#allocation22_spill]] }
  0x2d   : > { %s652_s24 = scalar_lea.vmem %s5403_s0, %s3477_s17  ;;  %s5407_s2 = sld [smem:[#allocation21_spill]] }
  0x2e   : > { %s4276_s15 = sshll.u32 %s4833_s18, 8  ;;  %s5408_s7 = sld [smem:[#allocation23_spill]] }
  0x2f   : > { %s4277_s0 = sshll.u32 %s4833_s18, 10 }
  0x30   : > { %s4844_s30 = scalar_lea.vmem %s5404_s1, %s4464_s27  ;;  %s4883_s12 = scalar_lea.vmem %s5358_s9, %s4277_s0 }
  0x31   : > { %s692_s27 = scalar_lea.vmem %s5359_s10, %s4833_s18 }
  0x32   : > { %s4849_s23 = scalar_lea.vmem %s5405_s3, %s4275_s20  ;;  %s695_s3 = scalar_lea.vmem %s5360_s11, %s4833_s18 }
  0x33   : > { %5406 = sst [smem:[#allocation18_spill]] %s4849_s23  ;;  %s4854_s17 = scalar_lea.vmem %s5407_s2, %s4465_s28 }
  0x34   : > { %s4872_s23 = scalar_lea.vmem %s5357_s8, %s4275_s20  ;;  %s4877_s29 = scalar_lea.vmem %s5408_s7, %s4276_s15 }
  0x35   : > { %s5409_s2 = sld [smem:[#allocation24_spill]]  ;;  %s5410_s15 = sand.u32 1, %s4651_s19  }
  0x36   : > { %s4899_s28 = scalar_lea.vmem [#allocation3], %s5410_s15  ;;  %s5411_s7 = sld [smem:[#allocation8_spill]] }
  0x3b   : > { %s698_s14 = scalar_lea.vmem %s5409_s2, %s4833_s18 }
  0x3c   : > { %p3486_p0 = scmp.ne.s32.totalorder %s5411_s7, 0 }
  0x3e   : > { %703 = sbr.rel (%p3486_p0) target bundleno = 69 (0x45), region = 84 }
  0x43   : > { %v704_v0 = vld [vmem:[%s652_s24] sm:$0xff]  ;;  %vm705_vm0 = vcmask 261120  }
  0x44   : > { %706 = vst.msk [vmem:[#allocation2] sm:$0xff] %vm705_vm0, %v704_v0 }
  0x45 PF: > { %v4279_v1 = vld [vmem:[%s4844_s30 + $0x8] sm:$0xff]  ;;  %v4281_v2 = vld [vmem:[%s4844_s30 + $0x18] sm:$0xff]  ;;  %v4278_v5 = vld [vmem:[%s4844_s30] sm:$0xff]  ;;  %vm817_vm1 = vcmask 261120   ;;  %vm1117_vm2 = vcmask 64512   ;;  %vm1253_vm3 = vcmask 1043456   ;;  %s5413_s13 = scalar_lea.vmem %s5353_s4, %s4833_s18  ;;  %s5415_s26 = scalar_lea.vmem %s5355_s6, %s4833_s18 }
  0x46   : > { %v4283_v3 = vld [vmem:[%s4844_s30 + $0x28] sm:$0xff]  ;;  %v4285_v4 = vld [vmem:[%s4844_s30 + $0x38] sm:$0xff]  ;;  %827 = vmatpush.bf16.msra.mxu0 %v4279_v1  ;;  %852 = vmatpush.bf16.msra.mxu1 %v4281_v2  ;;  %v4280_v6 = vld [vmem:[%s4844_s30 + $0x10] sm:$0xff]  ;;  %s5412_s1 = sld [smem:[#allocation18_spill]] }
  0x47   : > { %877 = vmatpush.bf16.msra.mxu2 %v4283_v3  ;;  %902 = vmatpush.bf16.msra.mxu3 %v4285_v4  ;;  %v4282_v8 = vld [vmem:[%s4844_s30 + $0x20] sm:$0xff]  ;;  %v4284_v9 = vld [vmem:[%s4844_s30 + $0x30] sm:$0xff]  ;;  %v4287_v10 = vld [vmem:[%s4844_s30 + $0x48] sm:$0xff]  ;;  %s5417_s22 = sld [smem:[#allocation8_spill]] }
  0x48   : > { %v4289_v11 = vld [vmem:[%s4844_s30 + $0x58] sm:$0xff]  ;;  %v4291_v13 = vld [vmem:[%s4844_s30 + $0x68] sm:$0xff]  ;;  %v4286_v15 = vld [vmem:[%s4844_s30 + $0x40] sm:$0xff] }
  0x49   : > { %v4293_v14 = vld [vmem:[%s4844_s30 + $0x78] sm:$0xff]  ;;  %v4288_v16 = vld [vmem:[%s4844_s30 + $0x50] sm:$0xff]  ;;  %v4290_v17 = vld [vmem:[%s4844_s30 + $0x60] sm:$0xff] }
  0x4a   : > { %828 = vmatpush.bf16.msra.mxu0 %v4278_v5  ;;  %853 = vmatpush.bf16.msra.mxu1 %v4280_v6  ;;  %v4292_v18 = vld [vmem:[%s4844_s30 + $0x70] sm:$0xff]  ;;  %v4299_v19 = vld [vmem:[%s4844_s30 + $0xa8] sm:$0xff]  ;;  %v4297_v21 = vld [vmem:[%s4844_s30 + $0x98] sm:$0xff] }
  0x4b   : > { %v4908_v7 = vld [vmem:[#allocation2] sm:$0xff]  ;;  %878 = vmatpush.bf16.msra.mxu2 %v4282_v8  ;;  %903 = vmatpush.bf16.msra.mxu3 %v4284_v9  ;;  %v4295_v20 = vld [vmem:[%s4844_s30 + $0x88] sm:$0xff]  ;;  %v4296_v24 = vld [vmem:[%s4844_s30 + $0x90] sm:$0xff] }
  0x4c   : > { %v708_v12 = vpack.c.bf16 %v4908_v7, %v4908_v7  ;;  %v4298_v22 = vld [vmem:[%s4844_s30 + $0xa0] sm:$0xff]  ;;  %v4301_v25 = vld [vmem:[%s4844_s30 + $0xb8] sm:$0xff]  ;;  %v4300_v26 = vld [vmem:[%s4844_s30 + $0xb0] sm:$0xff] }
  0x4d   : > { %v4294_v23 = vld [vmem:[%s4844_s30 + $0x80] sm:$0xff]  ;;  %v4547_v8 = vld [vmem:[%s4854_s17 + $0x8] ss:$0 sm:$0xff]  ;;  %v4548_v9 = vld [vmem:[%s4854_s17 + $0x9] ss:$0 sm:$0xff]  ;;  %p4263_p1 = scmp.ne.s32.totalorder %s5417_s22, 1 }
  0x4e   : > { %927 = vmatpush.bf16.msrb.mxu0 %v4287_v10  ;;  %952 = vmatpush.bf16.msrb.mxu1 %v4289_v11  ;;  %v4543_v33 = vld [vmem:[%s4854_s17 + $0x4] ss:$0 sm:$0xff]  ;;  %v4544_v34 = vld [vmem:[%s4854_s17 + $0x5] ss:$0 sm:$0xff]  ;;  %v4540_v41 = vld [vmem:[%s4854_s17 + $0x1] ss:$0 sm:$0xff] }
  0x4f   : > { %3495 = vmatmul.msk.bf16.vlgmr.msra.gmra.mxu0 %vm817_vm1, %v708_v12  ;;  %3504 = vmatmul.msk.bf16.vlgmr.msra.gmra.mxu1 %vm817_vm1, %v708_v12  ;;  %v4539_v44 = vld [vmem:[%s4854_s17] ss:$0 sm:$0xff]  ;;  %v4545_v45 = vld [vmem:[%s4854_s17 + $0x6] ss:$0 sm:$0xff]  ;;  %v4546_v46 = vld [vmem:[%s4854_s17 + $0x7] ss:$0 sm:$0xff] }
  0x50   : > { %3513 = vmatmul.msk.bf16.vlgmr.msra.gmra.mxu2 %vm817_vm1, %v708_v12  ;;  %3522 = vmatmul.msk.bf16.vlgmr.msra.gmra.mxu3 %vm817_vm1, %v708_v12  ;;  %v4541_v58 = vld [vmem:[%s4854_s17 + $0x2] ss:$0 sm:$0xff]  ;;  %v4542_v59 = vld [vmem:[%s4854_s17 + $0x3] ss:$0 sm:$0xff]  ;;  %s5418_s2 = sld [smem:[#allocation25_spill]] (!%p4263_p1) }
  0x51   : > { %977 = vmatpush.bf16.msrb.mxu2 %v4291_v13  ;;  %1002 = vmatpush.bf16.msrb.mxu3 %v4293_v14  ;;  %v4549_v14 = vld [vmem:[%s4854_s17 + $0xa] ss:$0 sm:$0xff] }
  0x52   : > { %928 = vmatpush.bf16.msrb.mxu0 %v4286_v15  ;;  %953 = vmatpush.bf16.msrb.mxu1 %v4288_v16 }
  0x55   : > { %978 = vmatpush.bf16.msrb.mxu2 %v4290_v17  ;;  %1003 = vmatpush.bf16.msrb.mxu3 %v4292_v18 }
  0x56   : > { %1027 = vmatpush.bf16.msra.mxu0 %v4295_v20  ;;  %1052 = vmatpush.bf16.msra.mxu1 %v4297_v21 }
  0x59   : > { %1077 = vmatpush.bf16.msra.mxu2 %v4299_v19  ;;  %1102 = vmatpush.bf16.msra.mxu3 %v4301_v25  ;;  %v4550_v25 = vld [vmem:[%s4854_s17 + $0xb] ss:$0 sm:$0xff]  ;;  %s5414_s17 = scalar_lea.vmem %s5354_s5, %s4833_s18 }
  0x5a   : > { %1028 = vmatpush.bf16.msra.mxu0 %v4294_v23  ;;  %1053 = vmatpush.bf16.msra.mxu1 %v4296_v24 }
  0x5d   : > { %1078 = vmatpush.bf16.msra.mxu2 %v4298_v22  ;;  %1103 = vmatpush.bf16.msra.mxu3 %v4300_v26 }
  0x5f   : > { %3531 = vmatmul.msk.bf16.vlgmr.msrb.gmra.mxu0 %vm817_vm1, %v708_v12  ;;  %3540 = vmatmul.msk.bf16.vlgmr.msrb.gmra.mxu1 %vm817_vm1, %v708_v12 }
  0x60   : > { %3549 = vmatmul.msk.bf16.vlgmr.msrb.gmra.mxu2 %vm817_vm1, %v708_v12  ;;  %3558 = vmatmul.msk.bf16.vlgmr.msrb.gmra.mxu3 %vm817_vm1, %v708_v12 }
  0x6f   : > { %3567 = vmatmul.msk.bf16.vlgmr.msra.gmra.mxu0 %vm817_vm1, %v708_v12  ;;  %3576 = vmatmul.msk.bf16.vlgmr.msra.gmra.mxu1 %vm817_vm1, %v708_v12 }
  0x70   : > { %3585 = vmatmul.msk.bf16.vlgmr.msra.gmra.mxu2 %vm817_vm1, %v708_v12  ;;  %3594 = vmatmul.msk.bf16.vlgmr.msra.gmra.mxu3 %vm817_vm1, %v708_v12 }
  0xcc   : > { %v830_v27 = vpop.f32.mrf.mxu0  ;;  %v855_v28 = vpop.f32.mrf.mxu1 }
  0xcd   : > { %v856_v49 = vadd.f32 %v4540_v41, %v855_v28  ;;  %v831_v52 = vadd.f32 %v4539_v44, %v830_v27 }
  0xcf   : > { %v1110_v57 = vpack.c.bf16 %v856_v49, %v856_v49  ;;  %v1109_v62 = vpack.c.bf16 %v831_v52, %v831_v52 }
  0xd3   : > { %v880_v29 = vpop.f32.mrf.mxu2  ;;  %v905_v30 = vpop.f32.mrf.mxu3 }
  0xd4   : > { %v832_v31 = vpop.f32.mrf.mxu0  ;;  %v857_v32 = vpop.f32.mrf.mxu1  ;;  %v881_v1 = vadd.f32 %v4541_v58, %v880_v29  ;;  %v906_v2 = vadd.f32 %v4542_v59, %v905_v30 }
  0xd6   : > { %v1111_v5 = vpack.c.bf16 %v881_v1, %v881_v1  ;;  %v1112_v6 = vpack.c.bf16 %v906_v2, %v906_v2 }
  0xdb   : > { %v882_v35 = vpop.f32.mrf.mxu2  ;;  %v907_v36 = vpop.f32.mrf.mxu3 }
  0xdc   : > { %v930_v37 = vpop.f32.mrf.mxu0  ;;  %v955_v38 = vpop.f32.mrf.mxu1 }
  0xdd   : > { %v931_v39 = vadd.f32 %v4543_v33, %v930_v37  ;;  %v956_v40 = vadd.f32 %v4544_v34, %v955_v38 }
  0xdf   : > { %v1113_v42 = vpack.c.bf16 %v931_v39, %v931_v39  ;;  %v1114_v43 = vpack.c.bf16 %v956_v40, %v956_v40 }
  0xe1   : > { %v1122_v47 = vsel %vm1117_vm2, %v1113_v42, 0  ;;  %v1141_v48 = vsel %vm1117_vm2, %v1114_v43, 0 }
  0xe2   : > { %1131 = vmatpush.bf16.xpose.msrb.mxu0 %v1122_v47  ;;  %1150 = vmatpush.bf16.xpose.msrb.mxu1 %v1141_v48 }
  0xe3   : > { %v980_v50 = vpop.f32.mrf.mxu2  ;;  %v1005_v51 = vpop.f32.mrf.mxu3 }
  0xe4   : > { %v981_v53 = vadd.f32 %v4545_v45, %v980_v50  ;;  %v1006_v54 = vadd.f32 %v4546_v46, %v1005_v51  ;;  %v932_v55 = vpop.f32.mrf.mxu0  ;;  %v957_v56 = vpop.f32.mrf.mxu1 }
  0xe6   : > { %v1115_v60 = vpack.c.bf16 %v981_v53, %v981_v53  ;;  %v1116_v61 = vpack.c.bf16 %v1006_v54, %v1006_v54 }
  0xe8   : > { %v1160_v63 = vsel %vm1117_vm2, %v1115_v60, 0  ;;  %v1179_v0 = vsel %vm1117_vm2, %v1116_v61, 0 }
  0xe9   : > { %1169 = vmatpush.bf16.xpose.msrb.mxu2 %v1160_v63  ;;  %1188 = vmatpush.bf16.xpose.msrb.mxu3 %v1179_v0 }
  0xea   : > { %3595 = vmatmul.msk.bf16.vlgmr.msrb.gmra.mxu0 %vm1117_vm2, %v1109_v62  ;;  %3596 = vmatmul.msk.bf16.vlgmr.msrb.gmra.mxu1 %vm1117_vm2, %v1110_v57 }
  0xeb   : > { %v982_v3 = vpop.f32.mrf.mxu2  ;;  %v1007_v4 = vpop.f32.mrf.mxu3 }
  0xec   : > { %v1030_v10 = vpop.f32.mrf.mxu0  ;;  %v1055_v11 = vpop.f32.mrf.mxu1 }
  0xed   : > { %v1031_v12 = vadd.f32 %v4547_v8, %v1030_v10  ;;  %v1056_v13 = vadd.f32 %v4548_v9, %v1055_v11 }
  0xef   : > { %v1246_v15 = vpack.c.bf16 %v1031_v12, %v1031_v12  ;;  %v1247_v16 = vpack.c.bf16 %v1056_v13, %v1056_v13 }
  0xf0   : > { %3597 = vmatmul.msk.bf16.vlgmr.msrb.gmra.mxu2 %vm1117_vm2, %v1111_v5  ;;  %3598 = vmatmul.msk.bf16.vlgmr.msrb.gmra.mxu3 %vm1117_vm2, %v1112_v6 }
  0xf1   : > { %v1255_v18 = vsel %vm1253_vm3, %v1246_v15, 0  ;;  %v1274_v19 = vsel %vm1253_vm3, %v1247_v16, 0 }
  0xf2   : > { %1264 = vmatpush.bf16.msra.mxu0 %v1255_v18  ;;  %1283 = vmatpush.bf16.msra.mxu1 %v1274_v19 }
  0xf3   : > { %v1080_v17 = vpop.f32.mrf.mxu2  ;;  %v1105_v26 = vpop.f32.mrf.mxu3 }
  0xf4   : > { %v1081_v20 = vadd.f32 %v4549_v14, %v1080_v17  ;;  %v1032_v22 = vpop.f32.mrf.mxu0  ;;  %v1057_v23 = vpop.f32.mrf.mxu1  ;;  %v1106_v28 = vadd.f32 %v4550_v25, %v1105_v26  ;;  %v1333_v25 = vld [vmem:[%s5412_s1 + $0x8] sm:$0xf] }
  0xf5   : > { %v1332_v23 = vld [vmem:[%s5412_s1 + $0x4] sm:$0xf]  ;;  %v1377_v26 = vsel %vm1253_vm3, %v1333_v25, 0  ;;  %v3617_v25 = vld [vmem:[%s4877_s29 + $0x8] sm:$0xf] }
  0xf6   : > { %v1248_v21 = vpack.c.bf16 %v1081_v20, %v1081_v20  ;;  %v1249_v29 = vpack.c.bf16 %v1106_v28, %v1106_v28 }
  0xf8   : > { %v1293_v24 = vsel %vm1253_vm3, %v1248_v21, 0  ;;  %v1312_v30 = vsel %vm1253_vm3, %v1249_v29, 0  ;;  %v1331_v21 = vld [vmem:[%s5412_s1] sm:$0xf] }
  0xf9   : > { %1302 = vmatpush.bf16.msra.mxu2 %v1293_v24  ;;  %1321 = vmatpush.bf16.msra.mxu3 %v1312_v30  ;;  %v1339_v22 = vsel %vm1253_vm3, %v1331_v21, 0  ;;  %v1358_v24 = vsel %vm1253_vm3, %v1332_v23, 0  ;;  %v4304_v21 = vld [vmem:[%s4877_s29 + $0x3c] sm:$0xf0] }
  0xfa   : > { %1348 = vmatpush.bf16.msrb.mxu0 %v1339_v22  ;;  %1367 = vmatpush.bf16.msrb.mxu1 %v1358_v24  ;;  %v4302_v22 = vld [vmem:[%s4877_s29 + $0x4] sm:$0xf] }
  0xfb   : > { %v1082_v27 = vpop.f32.mrf.mxu2  ;;  %v1107_v31 = vpop.f32.mrf.mxu3  ;;  %v3611_v24 = vld [vmem:[%s4877_s29 + $0x40] sm:$0xf0] }
  0xfc   : > { %v1334_v27 = vld [vmem:[%s5412_s1 + $0xc] sm:$0xf] }
  0xfd   : > { %1386 = vmatpush.bf16.msrb.mxu2 %v1377_v26  ;;  %v1396_v28 = vsel %vm1253_vm3, %v1334_v27, 0  ;;  %v4305_v26 = vld [vmem:[%s4877_s29 + $0x44] sm:$0xf0]  ;;  %v3614_v27 = vor.u32 %v4302_v22, %v3611_v24  ;;  %v4362_v22 = vld [vmem:[%s4883_s12 + $0x160] sm:$0xff] }
  0xfe   : > { %1405 = vmatpush.bf16.msrb.mxu3 %v1396_v28  ;;  %v3618_v28 = vor.u32 %v4305_v26, %v3617_v25  ;;  %v4378_v24 = vld [vmem:[%s4883_s12 + $0x1e0] sm:$0xff]  ;;  %v4353_v25 = vld [vmem:[%s4883_s12 + $0x118] sm:$0xff] }
  0xff   : > { %v4361_v26 = vld [vmem:[%s4883_s12 + $0x158] sm:$0xff] }
 0x167   : > { %v1133_v32 = vpop.f32.mrf.mxu0  ;;  %v1152_v33 = vpop.f32.mrf.mxu1 }
 0x168   : > { %v1194_v34 = vmul.f32 0.35355338, %v1133_v32  ;;  %v1195_v36 = vmul.f32 0.35355338, %v1152_v33 }
 0x16a   : > { %v1198_v35 = vsel %vm1117_vm2, %v1194_v34, -inf  ;;  %v1201_v39 = vsel %vm1117_vm2, %v1195_v36, -inf }
 0x16b   : > { %1199 = vmax.xlane.f32.xlu1 %v1198_v35 }
 0x16f   : > { %v1135_v37 = vpop.f32.mrf.mxu0  ;;  %v1154_v38 = vpop.f32.mrf.mxu1 }
 0x173   : > { %v1171_v40 = vpop.f32.mrf.mxu2  ;;  %v1190_v41 = vpop.f32.mrf.mxu3  ;;  %1202 = vmax.xlane.f32.xlu1 %v1201_v39 }
 0x174   : > { %v1196_v42 = vmul.f32 0.35355338, %v1171_v40  ;;  %v1197_v44 = vmul.f32 0.35355338, %v1190_v41 }
 0x176   : > { %v1204_v43 = vsel %vm1117_vm2, %v1196_v42, -inf  ;;  %v1207_v47 = vsel %vm1117_vm2, %v1197_v44, -inf }
 0x177   : > { %1205 = vmax.xlane.f32.xlu0 %v1204_v43 }
 0x17b   : > { %v1173_v45 = vpop.f32.mrf.mxu2  ;;  %v1192_v46 = vpop.f32.mrf.mxu3 }
 0x17f   : > { %1208 = vmax.xlane.f32.xlu0 %v1207_v47 }
 0x1de   : > { %v1200_v48 = vpop.xlane.xlu1 %1199 }
 0x1df   : > { %v1210_v49 = vsub.f32 %v1194_v34, %v1200_v48 }
 0x1e1   : > { %v1214_v50 = vmul.f32 1.442695, %v1210_v49 }
 0x1e3   : > { %4557 = vpow2.f32 %v1214_v50 }
 0x1e6   : > { %v1203_v51 = vpop.xlane.xlu1 %1202 }
 0x1e7   : > { %v1211_v52 = vsub.f32 %v1195_v36, %v1203_v51 }
 0x1e9   : > { %v4558_v53 = vpop.eup %4557  ;;  %v1216_v54 = vmul.f32 1.442695, %v1211_v52 }
 0x1ea   : > { %v1206_v55 = vpop.xlane.xlu0 %1205  ;;  %v1222_v56 = vsel %vm1117_vm2, %v4558_v53, 0.0 }
 0x1eb   : > { %4559 = vpow2.f32 %v1216_v54  ;;  %v1212_v57 = vsub.f32 %v1196_v42, %v1206_v55  ;;  %1223 = vadd.xlane.f32.xlu0 %v1222_v56 }
 0x1ed   : > { %v1218_v58 = vmul.f32 1.442695, %v1212_v57 }
 0x1ef   : > { %4561 = vpow2.f32 %v1218_v58 }
 0x1f1   : > { %v4560_v59 = vpop.eup %4559 }
 0x1f2   : > { %v1209_v60 = vpop.xlane.xlu0 %1208  ;;  %v1225_v61 = vsel %vm1117_vm2, %v4560_v59, 0.0 }
 0x1f3   : > { %v1213_v62 = vsub.f32 %v1197_v44, %v1209_v60  ;;  %1226 = vadd.xlane.f32.xlu1 %v1225_v61  ;;  %v4677_v60 = vmov 32.0  }
 0x1f5   : > { %v4562_v63 = vpop.eup %4561  ;;  %v1220_v0 = vmul.f32 1.442695, %v1213_v62 }
 0x1f6   : > { %v1228_v1 = vsel %vm1117_vm2, %v4562_v63, 0.0 }
 0x1f7   : > { %4563 = vpow2.f32 %v1220_v0  ;;  %1229 = vadd.xlane.f32.xlu2 %v1228_v1 }
 0x1fd   : > { %v4564_v2 = vpop.eup %4563 }
 0x1fe   : > { %v1231_v3 = vsel %vm1117_vm2, %v4564_v2, 0.0 }
 0x1ff   : > { %1232 = vadd.xlane.f32.xlu2 %v1231_v3 }
 0x25e   : > { %v1224_v4 = vpop.xlane.xlu0 %1223 }
 0x25f   : > { %4565 = vrcp.f32 %v1224_v4 }
 0x265   : > { %v4566_v5 = vpop.eup %4565 }
 0x266   : > { %v1238_v6 = vmul.f32 %v4566_v5, %v4558_v53  ;;  %v1227_v8 = vpop.xlane.xlu1 %1226  ;;  %v4551_v53 = vld [vmem:[%s5413_s13] ss:$0 sm:$0xff]  ;;  %s5419_s13 = sld [smem:[#allocation26_spill]] (!%p4263_p1) }
 0x267   : > { %4567 = vrcp.f32 %v1227_v8  ;;  %v3625_v8 = vld [vmem:[%s4877_s29 + $0x80] sm:$0xf] }
 0x268   : > { %v1242_v9 = vpack.c.bf16 %v1238_v6, %v1238_v6 }
 0x26a   : > { %v1230_v10 = vpop.xlane.xlu2 %1229  ;;  %3599 = vmatmul.msk.bf16.vlgmr.msra.gmra.mxu0 %vm1117_vm2, %v1242_v9  ;;  %v4308_v9 = vld [vmem:[%s4877_s29 + $0xbc] sm:$0xf0] }
 0x26b   : > { %4569 = vrcp.f32 %v1230_v10  ;;  %v4306_v10 = vld [vmem:[%s4877_s29 + $0x84] sm:$0xf] }
 0x26d   : > { %v4568_v11 = vpop.eup %4567 }
 0x26e   : > { %v1239_v12 = vmul.f32 %v4568_v11, %v4560_v59  ;;  %v3626_v11 = vor.u32 %v4308_v9, %v3625_v8 }
 0x270   : > { %v1243_v13 = vpack.c.bf16 %v1239_v12, %v1239_v12  ;;  %v3627_v12 = vld [vmem:[%s4877_s29 + $0xc0] sm:$0xf0]  ;;  %1531 = vmatpush.bf16.msra.mxu0 %v3626_v11  ;;  %v4365_v11 = vld [vmem:[%s4883_s12 + $0x178] sm:$0xff] }
 0x271   : > { %v4570_v14 = vpop.eup %4569 }
 0x272   : > { %v1240_v15 = vmul.f32 %v4570_v14, %v4562_v63  ;;  %v1233_v16 = vpop.xlane.xlu2 %1232  ;;  %3600 = vmatmul.msk.bf16.vlgmr.msra.gmra.mxu1 %vm1117_vm2, %v1243_v13  ;;  %v3633_v13 = vld [vmem:[%s4877_s29 + $0x88] sm:$0xf] }
 0x273   : > { %4571 = vrcp.f32 %v1233_v16  ;;  %v4309_v14 = vld [vmem:[%s4877_s29 + $0xc4] sm:$0xf0] }
 0x274   : > { %v1244_v17 = vpack.c.bf16 %v1240_v15, %v1240_v15  ;;  %4573 = vrcp.f32 %v4677_v60  ;;  %v3630_v15 = vor.u32 %v4306_v10, %v3627_v12  ;;  %v3634_v16 = vor.u32 %v4309_v14, %v3633_v13  ;;  %v4357_v10 = vld [vmem:[%s4883_s12 + $0x138] sm:$0xff]  ;;  %v4364_v14 = vld [vmem:[%s4883_s12 + $0x170] sm:$0xff] }
 0x275   : > { %v4373_v12 = vld [vmem:[%s4883_s12 + $0x1b8] sm:$0xff] }
 0x276   : > { %3601 = vmatmul.msk.bf16.vlgmr.msra.gmra.mxu2 %vm1117_vm2, %v1244_v17  ;;  %v4307_v17 = vld [vmem:[%s4877_s29 + $0x8c] sm:$0xf]  ;;  %1544 = vmatpush.bf16.msra.mxu1 %v3630_v15  ;;  %v4381_v13 = vld [vmem:[%s4883_s12 + $0x1f8] sm:$0xff]  ;;  %v4372_v15 = vld [vmem:[%s4883_s12 + $0x1b0] sm:$0xff] }
 0x277   : > { %1557 = vmatpush.bf16.msra.mxu2 %v3634_v16  ;;  %v4380_v16 = vld [vmem:[%s4883_s12 + $0x1f0] sm:$0xff] }
 0x279   : > { %v4572_v18 = vpop.eup %4571 }
 0x27a   : > { %v1241_v19 = vmul.f32 %v4572_v18, %v4564_v2  ;;  %v4574_v61 = vpop.eup %4573  ;;  %v3635_v18 = vld [vmem:[%s4877_s29 + $0xc8] sm:$0xf0]  ;;  %1545 = vmatpush.bf16.msra.mxu1 %v3614_v27  ;;  %v4352_v27 = vld [vmem:[%s4883_s12 + $0x110] sm:$0xff] }
 0x27b   : > { %v1430_v62 = vmul.f32 32.0, %v4574_v61  ;;  %vm1434_vm4 = vweird.f32 %v4574_v61  ;;  %1558 = vmatpush.bf16.msra.mxu2 %v3618_v28  ;;  %v4360_v28 = vld [vmem:[%s4883_s12 + $0x150] sm:$0xff] }
 0x27c   : > { %v1245_v20 = vpack.c.bf16 %v1241_v19, %v1241_v19  ;;  %v3638_v19 = vor.u32 %v4307_v17, %v3635_v18  ;;  %v4355_v17 = vld [vmem:[%s4883_s12 + $0x128] sm:$0xff] }
 0x27d   : > { %v1431_v63 = vsub.f32 1.0, %v1430_v62  ;;  %v4363_v18 = vld [vmem:[%s4883_s12 + $0x168] sm:$0xff] }
 0x27e   : > { %3602 = vmatmul.msk.bf16.vlgmr.msra.gmra.mxu3 %vm1117_vm2, %v1245_v20  ;;  %v3609_v20 = vld [vmem:[%s4877_s29] sm:$0xf] }
 0x27f   : > { %v1432_v0 = vmul.f32 %v4574_v61, %v1431_v63  ;;  %1570 = vmatpush.bf16.msra.mxu3 %v3638_v19  ;;  %v3610_v23 = vor.u32 %v4304_v21, %v3609_v20  ;;  %v4371_v19 = vld [vmem:[%s4883_s12 + $0x1a8] sm:$0xff]  ;;  %v4354_v21 = vld [vmem:[%s4883_s12 + $0x120] sm:$0xff] }
 0x280   : > { %v4379_v20 = vld [vmem:[%s4883_s12 + $0x1e8] sm:$0xff] }
 0x281   : > { %v1433_v1 = vadd.f32 %v4574_v61, %v1432_v0  ;;  %1532 = vmatpush.bf16.msra.mxu0 %v3610_v23  ;;  %v4370_v23 = vld [vmem:[%s4883_s12 + $0x1a0] sm:$0xff] }
 0x283   : > { %v5001_v2 = vsel %vm1434_vm4, %v4574_v61, %v1433_v1  ;;  %v4552_v1 = vld [vmem:[%s5414_s17] ss:$0 sm:$0xff] }
 0x2e7   : > { %v1266_v29 = vpop.f32.mrf.mxu0 }
 0x2e8   : > { %v1327_v30 = vpack.c.bf16 %v1266_v29, %v1266_v29  ;;  %v4303_v29 = vld [vmem:[%s4877_s29 + $0xc] sm:$0xf] }
 0x2ea   : > { %3603 = vmatmul.msk.bf16.vlgmr.msrb.gmra.mxu0 %vm1117_vm2, %v1327_v30  ;;  %v3619_v30 = vld [vmem:[%s4877_s29 + $0x48] sm:$0xf0] }
 0x2ef   : > { %v1268_v31 = vpop.f32.mrf.mxu0  ;;  %v1285_v32 = vpop.f32.mrf.mxu1 }
 0x2f0   : > { %v1328_v33 = vpack.c.bf16 %v1285_v32, %v1285_v32  ;;  %v3622_v31 = vor.u32 %v4303_v29, %v3619_v30  ;;  %v4369_v29 = vld [vmem:[%s4883_s12 + $0x198] sm:$0xff] }
 0x2f1   : > { %v4377_v30 = vld [vmem:[%s4883_s12 + $0x1d8] sm:$0xff] }
 0x2f2   : > { %3604 = vmatmul.msk.bf16.vlgmr.msrb.gmra.mxu1 %vm1117_vm2, %v1328_v33  ;;  %1571 = vmatpush.bf16.msra.mxu3 %v3622_v31  ;;  %v3661_v33 = vld [vmem:[%s4877_s29 + $0x90] sm:$0xf]  ;;  %v4351_v31 = vld [vmem:[%s4883_s12 + $0x108] sm:$0xff] }
 0x2f7   : > { %v1287_v34 = vpop.f32.mrf.mxu1 }
 0x2f8   : > { %v4348_v34 = vld [vmem:[%s4877_s29 + $0xcc] sm:$0xf0] }
 0x2f9   : > { %v1304_v35 = vpop.f32.mrf.mxu2 }
 0x2fa   : > { %v1329_v36 = vpack.c.bf16 %v1304_v35, %v1304_v35  ;;  %v4346_v35 = vld [vmem:[%s4877_s29 + $0x94] sm:$0xf] }
 0x2fc   : > { %3605 = vmatmul.msk.bf16.vlgmr.msrb.gmra.mxu2 %vm1117_vm2, %v1329_v36 }
 0x301   : > { %v1306_v37 = vpop.f32.mrf.mxu2  ;;  %v1323_v38 = vpop.f32.mrf.mxu3 }
 0x302   : > { %v1330_v39 = vpack.c.bf16 %v1323_v38, %v1323_v38  ;;  %v3662_v37 = vor.u32 %v4348_v34, %v3661_v33  ;;  %v3663_v38 = vld [vmem:[%s4877_s29 + $0xd0] sm:$0xf0] }
 0x303   : > { %v4368_v33 = vld [vmem:[%s4883_s12 + $0x190] sm:$0xff] }
 0x304   : > { %3606 = vmatmul.msk.bf16.vlgmr.msrb.gmra.mxu3 %vm1117_vm2, %v1330_v39  ;;  %v3669_v39 = vld [vmem:[%s4877_s29 + $0x98] sm:$0xf]  ;;  %1713 = vmatpush.bf16.msrb.mxu0 %v3662_v37  ;;  %v4376_v34 = vld [vmem:[%s4883_s12 + $0x1d0] sm:$0xff] }
 0x305   : > { %v4317_v37 = vld [vmem:[%s4883_s12 + $0x38] sm:$0xff] }
 0x309   : > { %v1325_v40 = vpop.f32.mrf.mxu3 }
 0x30a   : > { %v4349_v40 = vld [vmem:[%s4877_s29 + $0xd4] sm:$0xf0] }
 0x367   : > { %v1350_v41 = vpop.f32.mrf.mxu0 }
 0x368   : > { %v1411_v47 = vsel %vm817_vm1, %v1350_v41, 0.0  ;;  %v3666_v41 = vor.u32 %v4346_v35, %v3663_v38  ;;  %v4350_v35 = vld [vmem:[%s4883_s12 + $0x100] sm:$0xff]  ;;  %v4325_v38 = vld [vmem:[%s4883_s12 + $0x78] sm:$0xff] }
 0x36a   : > { %1726 = vmatpush.bf16.msrb.mxu1 %v3666_v41  ;;  %v4316_v41 = vld [vmem:[%s4883_s12 + $0x30] sm:$0xff] }
 0x36f   : > { %v1352_v42 = vpop.f32.mrf.mxu0  ;;  %v1369_v43 = vpop.f32.mrf.mxu1 }
 0x370   : > { %v1412_v46 = vsel %vm817_vm1, %v1369_v43, 0.0  ;;  %v3670_v42 = vor.u32 %v4349_v40, %v3669_v39  ;;  %v4347_v43 = vld [vmem:[%s4877_s29 + $0x9c] sm:$0xf]  ;;  %v4367_v39 = vld [vmem:[%s4883_s12 + $0x188] sm:$0xff] }
 0x371   : > { %v1413_v49 = vadd.f32 %v1412_v46, %v1411_v47  ;;  %v4375_v40 = vld [vmem:[%s4883_s12 + $0x1c8] sm:$0xff] }
 0x372   : > { %1739 = vmatpush.bf16.msrb.mxu2 %v3670_v42  ;;  %v4324_v42 = vld [vmem:[%s4883_s12 + $0x70] sm:$0xff] }
 0x377   : > { %v1371_v44 = vpop.f32.mrf.mxu1 }
 0x378   : > { %v3671_v44 = vld [vmem:[%s4877_s29 + $0xd8] sm:$0xf0] }
 0x379   : > { %v3674_v47 = vor.u32 %v4347_v43, %v3671_v44  ;;  %v4366_v43 = vld [vmem:[%s4883_s12 + $0x180] sm:$0xff] }
 0x37a   : > { %v4374_v44 = vld [vmem:[%s4883_s12 + $0x1c0] sm:$0xff] }
 0x37b   : > { %1752 = vmatpush.bf16.msrb.mxu3 %v3674_v47  ;;  %v4315_v47 = vld [vmem:[%s4883_s12 + $0x28] sm:$0xff] }
 0x37f   : > { %v1388_v45 = vpop.f32.mrf.mxu2 }
 0x380   : > { %v1414_v48 = vsel %vm817_vm1, %v1388_v45, 0.0  ;;  %v3645_v45 = vld [vmem:[%s4877_s29 + $0x10] sm:$0xf] }
 0x381   : > { %v1415_v50 = vadd.f32 %v1414_v48, %v1413_v49  ;;  %v4344_v48 = vld [vmem:[%s4877_s29 + $0x4c] sm:$0xf0]  ;;  %v4342_v49 = vld [vmem:[%s4877_s29 + $0x14] sm:$0xf] }
 0x387   : > { %v1390_v51 = vpop.f32.mrf.mxu2  ;;  %v1407_v52 = vpop.f32.mrf.mxu3 }
 0x388   : > { %v1416_v54 = vsel %vm817_vm1, %v1407_v52, 0.0  ;;  %v3647_v51 = vld [vmem:[%s4877_s29 + $0x50] sm:$0xf0]  ;;  %v3653_v52 = vld [vmem:[%s4877_s29 + $0x18] sm:$0xf] }
 0x389   : > { %v1417_v55 = vadd.f32 %v1416_v54, %v1415_v50  ;;  %v3646_v50 = vor.u32 %v4344_v48, %v3645_v45  ;;  %v3650_v54 = vor.u32 %v4342_v49, %v3647_v51  ;;  %v4333_v45 = vld [vmem:[%s4883_s12 + $0xb8] sm:$0xff]  ;;  %v4323_v48 = vld [vmem:[%s4883_s12 + $0x68] sm:$0xff]  ;;  %v4332_v49 = vld [vmem:[%s4883_s12 + $0xb0] sm:$0xff] }
 0x38a   : > { %v4314_v51 = vld [vmem:[%s4883_s12 + $0x20] sm:$0xff] }
 0x38b   : > { %v1422_v56 = vadd.f32 %v4551_v53, %v1417_v55  ;;  %v4345_v53 = vld [vmem:[%s4877_s29 + $0x54] sm:$0xf0]  ;;  %1714 = vmatpush.bf16.msrb.mxu0 %v3646_v50  ;;  %1727 = vmatpush.bf16.msrb.mxu1 %v3650_v54  ;;  %v4340_v50 = vld [vmem:[%s4883_s12 + $0xf0] sm:$0xff]  ;;  %v4339_v54 = vld [vmem:[%s4883_s12 + $0xe8] sm:$0xff] }
 0x38c   : > { %v3654_v55 = vor.u32 %v4345_v53, %v3653_v52  ;;  %v4322_v52 = vld [vmem:[%s4883_s12 + $0x60] sm:$0xff]  ;;  %v4331_v53 = vld [vmem:[%s4883_s12 + $0xa8] sm:$0xff] }
 0x38d   : > { %v1423_v57 = vadd.f32 %v1422_v56, %v4908_v7  ;;  %v4343_v56 = vld [vmem:[%s4877_s29 + $0x1c] sm:$0xf] }
 0x38e   : > { %1740 = vmatpush.bf16.msrb.mxu2 %v3654_v55  ;;  %v4313_v55 = vld [vmem:[%s4883_s12 + $0x18] sm:$0xff] }
 0x38f   : > { %v1409_v58 = vpop.f32.mrf.mxu3  ;;  %v1426_v59 = vsel %vm817_vm1, %v1423_v57, 0.0 }
 0x390   : > { %1427 = vadd.xlane.f32.xlu2 %v1426_v59 }
 0x403   : > { %v1428_v7 = vpop.xlane.xlu2 %1427 }
 0x404   : > { %v1436_v3 = vmul.f32 %v5001_v2, %v1428_v7 }
 0x406   : > { %v5004_v4 = vsub.f32 %v1423_v57, %v1436_v3  ;;  %v3655_v57 = vld [vmem:[%s4877_s29 + $0x58] sm:$0xf0]  ;;  %v4553_v3 = vld [vmem:[%s5415_s26] ss:$0 sm:$0xff] }
 0x407   : > { %v3658_v58 = vor.u32 %v4343_v56, %v3655_v57  ;;  %v4321_v56 = vld [vmem:[%s4883_s12 + $0x58] sm:$0xff]  ;;  %v4330_v57 = vld [vmem:[%s4883_s12 + $0xa0] sm:$0xff] }
 0x408   : > { %v1438_v5 = vmul.f32 %v5004_v4, %v5004_v4 }
 0x409   : > { %1753 = vmatpush.bf16.msrb.mxu3 %v3658_v58  ;;  %v4338_v58 = vld [vmem:[%s4883_s12 + $0xe0] sm:$0xff] }
 0x40a   : > { %v1439_v6 = vsel %vm817_vm1, %v1438_v5, 0.0 }
 0x40b   : > { %1440 = vadd.xlane.f32.xlu0 %v1439_v6 }
 0x47e   : > { %v1441_v32 = vpop.xlane.xlu0 %1440 }
 0x47f   : > { %v1442_v36 = vmul.f32 %v1441_v32, %v5001_v2  ;;  %v4359_v32 = vld [vmem:[%s4883_s12 + $0x148] sm:$0xff] }
 0x481   : > { %v1443_v46 = vadd.f32 1e-05, %v1442_v36  ;;  %v4358_v36 = vld [vmem:[%s4883_s12 + $0x140] sm:$0xff] }
 0x483   : > { %4575 = vrsqrt.f32 %v1443_v46  ;;  %vm1450_vm6 = vweird.f32 %v1443_v46 }
 0x489   : > { %v4576_v59 = vpop.eup %4575 }
 0x48a   : > { %v1445_v60 = vmul.f32 %v4576_v59, %v1443_v46  ;;  %vm1451_vm5 = vweird.f32 %v4576_v59  ;;  %v4341_v46 = vld [vmem:[%s4883_s12 + $0xf8] sm:$0xff] }
 0x48b   : > { %vm1452_vm7 = vmor %vm1450_vm6, %vm1451_vm5 }
 0x48c   : > { %v1446_v61 = vmul.f32 %v4576_v59, %v1445_v60  ;;  %v4320_v60 = vld [vmem:[%s4883_s12 + $0x50] sm:$0xff] }
 0x48e   : > { %v1447_v62 = vmul.f32 0.5, %v1446_v61  ;;  %v4329_v61 = vld [vmem:[%s4883_s12 + $0x98] sm:$0xff] }
 0x490   : > { %v1448_v63 = vsub.f32 1.5, %v1447_v62  ;;  %v4337_v62 = vld [vmem:[%s4883_s12 + $0xd8] sm:$0xff] }
 0x492   : > { %v1449_v0 = vmul.f32 %v4576_v59, %v1448_v63  ;;  %v4311_v63 = vld [vmem:[%s4883_s12 + $0x8] sm:$0xff] }
 0x494   : > { %v1453_v7 = vsel %vm1452_vm7, %v4576_v59, %v1449_v0  ;;  %v4312_v59 = vld [vmem:[%s4883_s12 + $0x10] sm:$0xff]  ;;  %v4319_v0 = vld [vmem:[%s4883_s12 + $0x48] sm:$0xff] }
 0x495   : > { %v1454_v5 = vmul.f32 %v1453_v7, %v5004_v4  ;;  %v4356_v4 = vld [vmem:[%s4883_s12 + $0x130] sm:$0xff] }
 0x497   : > { %v1458_v6 = vmul.f32 %v4552_v1, %v1454_v5  ;;  %v4328_v1 = vld [vmem:[%s4883_s12 + $0x90] sm:$0xff] }
 0x498   : > { %v4336_v5 = vld [vmem:[%s4883_s12 + $0xd0] sm:$0xff] }
 0x499   : > { %v5053_v8 = vadd.f32 %v4553_v3, %v1458_v6  ;;  %v4310_v6 = vld [vmem:[%s4883_s12] sm:$0xff] }
 0x49b   : > { %v5057_v9 = vpack.c.bf16 %v5053_v8, %v5053_v8 }
 0x49d   : > { %3639 = vmatmul.msk.bf16.vlgmr.msra.gmra.mxu0 %vm817_vm1, %v5057_v9  ;;  %3640 = vmatmul.msk.bf16.vlgmr.msra.gmra.mxu1 %vm817_vm1, %v5057_v9 }
 0x49e   : > { %3641 = vmatmul.msk.bf16.vlgmr.msra.gmra.mxu2 %vm817_vm1, %v5057_v9  ;;  %3642 = vmatmul.msk.bf16.vlgmr.msra.gmra.mxu3 %vm817_vm1, %v5057_v9 }
 0x49f   : > { %2023 = vmatpush.bf16.msra.mxu0 %v4357_v10  ;;  %2036 = vmatpush.bf16.msra.mxu1 %v4365_v11  ;;  %v4318_v10 = vld [vmem:[%s4883_s12 + $0x40] sm:$0xff]  ;;  %v4327_v11 = vld [vmem:[%s4883_s12 + $0x88] sm:$0xff] }
 0x4a0   : > { %2049 = vmatpush.bf16.msra.mxu2 %v4373_v12  ;;  %2062 = vmatpush.bf16.msra.mxu3 %v4381_v13  ;;  %v4335_v12 = vld [vmem:[%s4883_s12 + $0xc8] sm:$0xff] }
 0x4a3   : > { %2024 = vmatpush.bf16.msra.mxu0 %v4356_v4  ;;  %2037 = vmatpush.bf16.msra.mxu1 %v4364_v14  ;;  %v4326_v14 = vld [vmem:[%s4883_s12 + $0x80] sm:$0xff] }
 0x4a4   : > { %2050 = vmatpush.bf16.msra.mxu2 %v4372_v15  ;;  %2063 = vmatpush.bf16.msra.mxu3 %v4380_v16  ;;  %v4334_v15 = vld [vmem:[%s4883_s12 + $0xc0] sm:$0xff] }
 0x4a7   : > { %2025 = vmatpush.bf16.msra.mxu0 %v4355_v17  ;;  %2038 = vmatpush.bf16.msra.mxu1 %v4363_v18  ;;  %v1657_v18 = vld [vmem:[%s4872_s23 + $0x4] sm:$0xf] }
 0x4a8   : > { %2051 = vmatpush.bf16.msra.mxu2 %v4371_v19  ;;  %2064 = vmatpush.bf16.msra.mxu3 %v4379_v20  ;;  %v1659_v19 = vperm.slane %v1657_v18, 0  ;;  %v1660_v20 = vperm.slane %v1657_v18, 1 }
 0x4ab   : > { %2026 = vmatpush.bf16.msra.mxu0 %v4354_v21  ;;  %2039 = vmatpush.bf16.msra.mxu1 %v4362_v22 }
 0x4ac   : > { %2052 = vmatpush.bf16.msra.mxu2 %v4370_v23  ;;  %2065 = vmatpush.bf16.msra.mxu3 %v4378_v24 }
 0x4ad   : > { %3675 = vmatmul.msk.bf16.vlgmr.msrb.gmra.mxu0 %vm817_vm1, %v5057_v9  ;;  %3676 = vmatmul.msk.bf16.vlgmr.msrb.gmra.mxu1 %vm817_vm1, %v5057_v9 }
 0x4ae   : > { %3677 = vmatmul.msk.bf16.vlgmr.msrb.gmra.mxu2 %vm817_vm1, %v5057_v9  ;;  %3678 = vmatmul.msk.bf16.vlgmr.msrb.gmra.mxu3 %vm817_vm1, %v5057_v9 }
 0x4af   : > { %2027 = vmatpush.bf16.msra.mxu0 %v4353_v25  ;;  %2040 = vmatpush.bf16.msra.mxu1 %v4361_v26  ;;  %v3953_v25 = vld [vmem:[%s4877_s29 + $0xa0] sm:$0xf] }
 0x4b0   : > { %2053 = vmatpush.bf16.msra.mxu2 %v4369_v29  ;;  %2066 = vmatpush.bf16.msra.mxu3 %v4377_v30  ;;  %v4386_v29 = vld [vmem:[%s4877_s29 + $0xa4] sm:$0xf] }
 0x4b1   : > { %v3955_v30 = vld [vmem:[%s4877_s29 + $0xe0] sm:$0xf0] }
 0x4b3   : > { %2028 = vmatpush.bf16.msra.mxu0 %v4352_v27  ;;  %2041 = vmatpush.bf16.msra.mxu1 %v4360_v28  ;;  %v4388_v28 = vld [vmem:[%s4877_s29 + $0xdc] sm:$0xf0] }
 0x4b4   : > { %2054 = vmatpush.bf16.msra.mxu2 %v4368_v33  ;;  %2067 = vmatpush.bf16.msra.mxu3 %v4376_v34  ;;  %v1661_v33 = vperm.slane %v1657_v18, 2  ;;  %v1662_v34 = vperm.slane %v1657_v18, 3 }
 0x4b7   : > { %2029 = vmatpush.bf16.msra.mxu0 %v4351_v31  ;;  %2042 = vmatpush.bf16.msra.mxu1 %v4359_v32 }
 0x4b8   : > { %2055 = vmatpush.bf16.msra.mxu2 %v4367_v39  ;;  %2068 = vmatpush.bf16.msra.mxu3 %v4375_v40 }
 0x4bb   : > { %2030 = vmatpush.bf16.msra.mxu0 %v4350_v35  ;;  %2043 = vmatpush.bf16.msra.mxu1 %v4358_v36  ;;  %v3954_v35 = vor.u32 %v4388_v28, %v3953_v25  ;;  %v3958_v36 = vor.u32 %v4386_v29, %v3955_v30  ;;  %v4404_v28 = vld [vmem:[%s4883_s12 + $0x270] sm:$0xff]  ;;  %v4395_v29 = vld [vmem:[%s4883_s12 + $0x228] sm:$0xff] }
 0x4bc   : > { %2056 = vmatpush.bf16.msra.mxu2 %v4366_v43  ;;  %2069 = vmatpush.bf16.msra.mxu3 %v4374_v44  ;;  %v1472_v43 = vld [vmem:[%s4872_s23] sm:$0xf]  ;;  %v4403_v30 = vld [vmem:[%s4883_s12 + $0x268] sm:$0xff] }
 0x4bd   : > { %v1477_v18 = vperm.slane %v1472_v43, 3 }
 0x4bf   : > { %2267 = vmatpush.bf16.msrb.mxu0 %v4317_v37  ;;  %2280 = vmatpush.bf16.msrb.mxu1 %v4325_v38  ;;  %v3937_v37 = vld [vmem:[%s4877_s29 + $0x20] sm:$0xf] }
 0x4c0   : > { %2293 = vmatpush.bf16.msrb.mxu2 %v4333_v45  ;;  %2306 = vmatpush.bf16.msrb.mxu3 %v4341_v46  ;;  %v4384_v38 = vld [vmem:[%s4877_s29 + $0x5c] sm:$0xf0] }
 0x4c1   : > { %v3938_v46 = vor.u32 %v4384_v38, %v3937_v37  ;;  %v4412_v37 = vld [vmem:[%s4883_s12 + $0x2b0] sm:$0xff] }
 0x4c2   : > { %v4420_v38 = vld [vmem:[%s4883_s12 + $0x2f0] sm:$0xff] }
 0x4c3   : > { %2268 = vmatpush.bf16.msrb.mxu0 %v4316_v41  ;;  %2281 = vmatpush.bf16.msrb.mxu1 %v4324_v42  ;;  %v4382_v41 = vld [vmem:[%s4877_s29 + $0x24] sm:$0xf] }
 0x4c4   : > { %2294 = vmatpush.bf16.msrb.mxu2 %v4332_v49  ;;  %2307 = vmatpush.bf16.msrb.mxu3 %v4340_v50  ;;  %v3939_v42 = vld [vmem:[%s4877_s29 + $0x60] sm:$0xf0] }
 0x4c7   : > { %2269 = vmatpush.bf16.msrb.mxu0 %v4315_v47  ;;  %2282 = vmatpush.bf16.msrb.mxu1 %v4323_v48  ;;  %v3961_v47 = vld [vmem:[%s4877_s29 + $0xa8] sm:$0xf] }
 0x4c8   : > { %2295 = vmatpush.bf16.msrb.mxu2 %v4331_v53  ;;  %2308 = vmatpush.bf16.msrb.mxu3 %v4339_v54  ;;  %v4389_v53 = vld [vmem:[%s4877_s29 + $0xe4] sm:$0xf0]  ;;  %v4387_v54 = vld [vmem:[%s4877_s29 + $0xac] sm:$0xf] }
 0x4cb   : > { %2270 = vmatpush.bf16.msrb.mxu0 %v4314_v51  ;;  %2283 = vmatpush.bf16.msrb.mxu1 %v4322_v52  ;;  %v3942_v52 = vor.u32 %v4382_v41, %v3939_v42  ;;  %v4411_v41 = vld [vmem:[%s4883_s12 + $0x2a8] sm:$0xff] }
 0x4cc   : > { %2296 = vmatpush.bf16.msrb.mxu2 %v4330_v57  ;;  %2309 = vmatpush.bf16.msrb.mxu3 %v4338_v58  ;;  %v1475_v57 = vperm.slane %v1472_v43, 1  ;;  %v4419_v42 = vld [vmem:[%s4883_s12 + $0x2e8] sm:$0xff] }
 0x4cf   : > { %2271 = vmatpush.bf16.msrb.mxu0 %v4313_v55  ;;  %2284 = vmatpush.bf16.msrb.mxu1 %v4321_v56  ;;  %v3963_v55 = vld [vmem:[%s4877_s29 + $0xe8] sm:$0xf0]  ;;  %v1474_v56 = vperm.slane %v1472_v43, 0 }
 0x4d0   : > { %2297 = vmatpush.bf16.msrb.mxu2 %v4329_v61  ;;  %2310 = vmatpush.bf16.msrb.mxu3 %v4337_v62  ;;  %v3966_v61 = vor.u32 %v4387_v54, %v3963_v55  ;;  %v3945_v62 = vld [vmem:[%s4877_s29 + $0x28] sm:$0xf]  ;;  %v4408_v54 = vld [vmem:[%s4883_s12 + $0x290] sm:$0xff] }
 0x4d1   : > { %v4416_v55 = vld [vmem:[%s4883_s12 + $0x2d0] sm:$0xff] }
 0x4d3   : > { %2272 = vmatpush.bf16.msrb.mxu0 %v4312_v59  ;;  %2285 = vmatpush.bf16.msrb.mxu1 %v4320_v60  ;;  %v3962_v60 = vor.u32 %v4389_v53, %v3961_v47  ;;  %v4410_v47 = vld [vmem:[%s4883_s12 + $0x2a0] sm:$0xff]  ;;  %v4417_v53 = vld [vmem:[%s4883_s12 + $0x2d8] sm:$0xff] }
 0x4d4   : > { %2298 = vmatpush.bf16.msrb.mxu2 %v4328_v1  ;;  %2311 = vmatpush.bf16.msrb.mxu3 %v4336_v5  ;;  %v4385_v1 = vld [vmem:[%s4877_s29 + $0x64] sm:$0xf0]  ;;  %v4383_v5 = vld [vmem:[%s4877_s29 + $0x2c] sm:$0xf] }
 0x4d7   : > { %2273 = vmatpush.bf16.msrb.mxu0 %v4311_v63  ;;  %2286 = vmatpush.bf16.msrb.mxu1 %v4319_v0 }
 0x4d8   : > { %2299 = vmatpush.bf16.msrb.mxu2 %v4327_v11  ;;  %2312 = vmatpush.bf16.msrb.mxu3 %v4335_v12 }
 0x4db   : > { %2274 = vmatpush.bf16.msrb.mxu0 %v4310_v6  ;;  %2287 = vmatpush.bf16.msrb.mxu1 %v4318_v10  ;;  %v3947_v6 = vld [vmem:[%s4877_s29 + $0x68] sm:$0xf0] }
 0x4dc   : > { %2300 = vmatpush.bf16.msrb.mxu2 %v4326_v14  ;;  %2313 = vmatpush.bf16.msrb.mxu3 %v4334_v15  ;;  %v3946_v15 = vor.u32 %v4385_v1, %v3945_v62  ;;  %v4426_v1 = vld [vmem:[%s4877_s29 + $0xb4] sm:$0xf] }
 0x51a   : > { %v5132_v7 = vpop.f32.mrf.mxu0  ;;  %v5134_v3 = vpop.f32.mrf.mxu1 }
 0x51b   : > { %v1535_v10 = vadd.f32 %v5132_v7, %v1474_v56  ;;  %v1548_v11 = vadd.f32 %v5134_v3, %v1475_v57 }
 0x521   : > { %v5141_v13 = vpop.f32.mrf.mxu2  ;;  %v5143_v4 = vpop.f32.mrf.mxu3 }
 0x522   : > { %v1536_v16 = vpop.f32.mrf.mxu0  ;;  %v1549_v17 = vpop.f32.mrf.mxu1  ;;  %v1574_v7 = vadd.f32 %v5143_v4, %v1477_v18  ;;  %v4405_v4 = vld [vmem:[%s4883_s12 + $0x278] sm:$0xff]  ;;  %v4101_v18 = vld [vmem:[%s4877_s29 + $0x30] sm:$0xf] }
 0x523   : > { %v3950_v16 = vor.u32 %v4383_v5, %v3947_v6  ;;  %v1476_v17 = vperm.slane %v1472_v43, 2  ;;  %v4391_v43 = vld [vmem:[%s4883_s12 + $0x208] sm:$0xff]  ;;  %v4406_v5 = vld [vmem:[%s4883_s12 + $0x280] sm:$0xff] }
 0x524   : > { %v4414_v6 = vld [vmem:[%s4883_s12 + $0x2c0] sm:$0xff] }
 0x529   : > { %v1562_v21 = vpop.f32.mrf.mxu2  ;;  %v1575_v22 = vpop.f32.mrf.mxu3 }
 0x52a   : > { %v1716_v23 = vpop.f32.mrf.mxu0  ;;  %v1729_v24 = vpop.f32.mrf.mxu1  ;;  %v1561_v21 = vadd.f32 %v5141_v13, %v1476_v17  ;;  %v4397_v13 = vld [vmem:[%s4883_s12 + $0x238] sm:$0xff] }
 0x52b   : > { %v1717_v26 = vadd.f32 %v1716_v23, %v1659_v19  ;;  %v1730_v27 = vadd.f32 %v1729_v24, %v1660_v20  ;;  %v1577_v19 = vmax.f32 %v1535_v10, 0.0  ;;  %v1578_v20 = vmax.f32 %v1548_v11, 0.0  ;;  %v4119_v11 = vld [vmem:[%s4877_s29 + $0xf0] sm:$0xf0] }
 0x52c   : > { %v1579_v23 = vmax.f32 %v1561_v21, 0.0  ;;  %v1580_v24 = vmax.f32 %v1574_v7, 0.0  ;;  %v4103_v7 = vld [vmem:[%s4877_s29 + $0x70] sm:$0xf0] }
 0x52d   : > { %v1759_v31 = vmax.f32 %v1717_v26, 0.0  ;;  %v1760_v32 = vmax.f32 %v1730_v27, 0.0  ;;  %v1645_v3 = vpack.c.bf16 %v1577_v19, %v1577_v19  ;;  %v1646_v22 = vpack.c.bf16 %v1578_v20, %v1578_v20  ;;  %v4396_v27 = vld [vmem:[%s4883_s12 + $0x230] sm:$0xff] }
 0x52e   : > { %v1647_v25 = vpack.c.bf16 %v1579_v23, %v1579_v23  ;;  %v1648_v26 = vpack.c.bf16 %v1580_v24, %v1580_v24  ;;  %v4424_v19 = vld [vmem:[%s4877_s29 + $0x6c] sm:$0xf0]  ;;  %v4422_v20 = vld [vmem:[%s4877_s29 + $0x34] sm:$0xf] }
 0x52f   : > { %v1827_v39 = vpack.c.bf16 %v1759_v31, %v1759_v31  ;;  %v1828_v40 = vpack.c.bf16 %v1760_v32, %v1760_v32  ;;  %v4394_v31 = vld [vmem:[%s4883_s12 + $0x220] sm:$0xff]  ;;  %v4102_v21 = vor.u32 %v4424_v19, %v4101_v18  ;;  %v4433_v19 = vld [vmem:[%s4883_s12 + $0x318] sm:$0xff] }
 0x530   : > { %v4402_v32 = vld [vmem:[%s4883_s12 + $0x260] sm:$0xff] }
 0x531   : > { %v1742_v44 = vpop.f32.mrf.mxu2  ;;  %v1755_v45 = vpop.f32.mrf.mxu3  ;;  %2031 = vmatmul.bf16.vlgmr.msra.gmra.mxu0 %v1827_v39  ;;  %2044 = vmatmul.bf16.vlgmr.msra.gmra.mxu1 %v1828_v40  ;;  %v4392_v39 = vld [vmem:[%s4883_s12 + $0x210] sm:$0xff]  ;;  %v4442_v18 = vld [vmem:[%s4883_s12 + $0x360] sm:$0xff] }
 0x532   : > { %v1743_v48 = vadd.f32 %v1742_v44, %v1661_v33  ;;  %v1756_v49 = vadd.f32 %v1755_v45, %v1662_v34  ;;  %v1718_v50 = vpop.f32.mrf.mxu0  ;;  %v1731_v51 = vpop.f32.mrf.mxu1  ;;  %2383 = vmatpush.bf16.msra.mxu0 %v3954_v35  ;;  %2396 = vmatpush.bf16.msra.mxu1 %v3958_v36  ;;  %v4413_v33 = vld [vmem:[%s4883_s12 + $0x2b8] sm:$0xff]  ;;  %v4400_v40 = vld [vmem:[%s4883_s12 + $0x250] sm:$0xff]  ;;  %v4399_v44 = vld [vmem:[%s4883_s12 + $0x248] sm:$0xff] }
 0x533   : > { %v4421_v34 = vld [vmem:[%s4883_s12 + $0x2f8] sm:$0xff]  ;;  %v4390_v50 = vld [vmem:[%s4883_s12 + $0x200] sm:$0xff] }
 0x534   : > { %v1761_v58 = vmax.f32 %v1743_v48, 0.0  ;;  %v1762_v59 = vmax.f32 %v1756_v49, 0.0  ;;  %v4393_v35 = vld [vmem:[%s4883_s12 + $0x218] sm:$0xff]  ;;  %v4418_v48 = vld [vmem:[%s4883_s12 + $0x2e0] sm:$0xff] }
 0x535   : > { %v4401_v36 = vld [vmem:[%s4883_s12 + $0x258] sm:$0xff]  ;;  %v4398_v51 = vld [vmem:[%s4883_s12 + $0x240] sm:$0xff] }
 0x536   : > { %v1829_v63 = vpack.c.bf16 %v1761_v58, %v1761_v58  ;;  %v1830_v0 = vpack.c.bf16 %v1762_v59, %v1762_v59  ;;  %2384 = vmatpush.bf16.msra.mxu0 %v3938_v46  ;;  %2397 = vmatpush.bf16.msra.mxu1 %v3942_v52  ;;  %v4409_v52 = vld [vmem:[%s4883_s12 + $0x298] sm:$0xff]  ;;  %v4407_v58 = vld [vmem:[%s4883_s12 + $0x288] sm:$0xff] }
 0x537   : > { %v4415_v59 = vld [vmem:[%s4883_s12 + $0x2c8] sm:$0xff] }
 0x538   : > { %2057 = vmatmul.bf16.vlgmr.msra.gmra.mxu2 %v1829_v63  ;;  %2070 = vmatmul.bf16.vlgmr.msra.gmra.mxu3 %v1830_v0  ;;  %v4117_v63 = vld [vmem:[%s4877_s29 + $0xb0] sm:$0xf] }
 0x539   : > { %v1744_v12 = vpop.f32.mrf.mxu2  ;;  %v1757_v14 = vpop.f32.mrf.mxu3  ;;  %2409 = vmatpush.bf16.msra.mxu2 %v3962_v60  ;;  %2422 = vmatpush.bf16.msra.mxu3 %v3966_v61  ;;  %v4428_v0 = vld [vmem:[%s4877_s29 + $0xec] sm:$0xf0] }
 0x53a   : > { %v4118_v10 = vor.u32 %v4428_v0, %v4117_v63 }
 0x53d   : > { %2410 = vmatpush.bf16.msra.mxu2 %v3946_v15  ;;  %2423 = vmatpush.bf16.msra.mxu3 %v3950_v16  ;;  %v4122_v16 = vor.u32 %v4426_v1, %v4119_v11 }
 0x541   : > { %2275 = vmatmul.bf16.vlgmr.msrb.gmra.mxu0 %v1645_v3  ;;  %2288 = vmatmul.bf16.vlgmr.msrb.gmra.mxu1 %v1646_v22  ;;  %v4106_v22 = vor.u32 %v4422_v20, %v4103_v7  ;;  %v4441_v20 = vld [vmem:[%s4883_s12 + $0x358] sm:$0xff] }
 0x542   : > { %2693 = vmatpush.bf16.msrb.mxu0 %v4397_v13  ;;  %2706 = vmatpush.bf16.msrb.mxu1 %v4405_v4  ;;  %v4427_v13 = vld [vmem:[%s4877_s29 + $0xbc] sm:$0xf] }
 0x543   : > { %v4461_v7 = vld [vmem:[%s4883_s12 + $0x3f8] sm:$0xff] }
 0x546   : > { %2694 = vmatpush.bf16.msrb.mxu0 %v4396_v27  ;;  %2707 = vmatpush.bf16.msrb.mxu1 %v4404_v28 }
 0x548   : > { %2301 = vmatmul.bf16.vlgmr.msrb.gmra.mxu2 %v1647_v25  ;;  %2314 = vmatmul.bf16.vlgmr.msrb.gmra.mxu3 %v1648_v26  ;;  %v4125_v25 = vld [vmem:[%s4877_s29 + $0xb8] sm:$0xf] }
 0x549   : > { %2719 = vmatpush.bf16.msrb.mxu2 %v4413_v33  ;;  %2732 = vmatpush.bf16.msrb.mxu3 %v4421_v34  ;;  %v4429_v26 = vld [vmem:[%s4877_s29 + $0xf4] sm:$0xf0]  ;;  %v4423_v33 = vld [vmem:[%s4877_s29 + $0x3c] sm:$0xf] }
 0x54a   : > { %2695 = vmatpush.bf16.msrb.mxu0 %v4395_v29  ;;  %2708 = vmatpush.bf16.msrb.mxu1 %v4403_v30  ;;  %v4126_v28 = vor.u32 %v4429_v26, %v4125_v25  ;;  %v4127_v29 = vld [vmem:[%s4877_s29 + $0xf8] sm:$0xf0]  ;;  %v4109_v30 = vld [vmem:[%s4877_s29 + $0x38] sm:$0xf]  ;;  %v4439_v25 = vld [vmem:[%s4883_s12 + $0x348] sm:$0xff] }
 0x54b   : > { %v4111_v34 = vld [vmem:[%s4877_s29 + $0x78] sm:$0xf0]  ;;  %v4451_v26 = vld [vmem:[%s4883_s12 + $0x3a8] sm:$0xff] }
 0x54d   : > { %2720 = vmatpush.bf16.msrb.mxu2 %v4412_v37  ;;  %2733 = vmatpush.bf16.msrb.mxu3 %v4420_v38  ;;  %v4114_v37 = vor.u32 %v4423_v33, %v4111_v34  ;;  %v4456_v33 = vld [vmem:[%s4883_s12 + $0x3d0] sm:$0xff] }
 0x54e   : > { %2696 = vmatpush.bf16.msrb.mxu0 %v4394_v31  ;;  %2709 = vmatpush.bf16.msrb.mxu1 %v4402_v32  ;;  %v4425_v31 = vld [vmem:[%s4877_s29 + $0x74] sm:$0xf0]  ;;  %v4130_v32 = vor.u32 %v4427_v13, %v4127_v29  ;;  %v4459_v13 = vld [vmem:[%s4883_s12 + $0x3e8] sm:$0xff]  ;;  %v4458_v29 = vld [vmem:[%s4883_s12 + $0x3e0] sm:$0xff] }
 0x551   : > { %3967 = vmatmul.msk.bf16.vlgmr.msra.gmra.mxu0 %vm817_vm1, %v5057_v9  ;;  %3968 = vmatmul.msk.bf16.vlgmr.msra.gmra.mxu1 %vm817_vm1, %v5057_v9 }
 0x552   : > { %2697 = vmatpush.bf16.msrb.mxu0 %v4393_v35  ;;  %2710 = vmatpush.bf16.msrb.mxu1 %v4401_v36  ;;  %v2327_v35 = vld [vmem:[%s4872_s23 + $0x8] sm:$0xf]  ;;  %v4110_v36 = vor.u32 %v4425_v31, %v4109_v30  ;;  %v4449_v30 = vld [vmem:[%s4883_s12 + $0x398] sm:$0xff] }
 0x553   : > { %2721 = vmatpush.bf16.msrb.mxu2 %v4411_v41  ;;  %2734 = vmatpush.bf16.msrb.mxu3 %v4419_v42  ;;  %v2330_v41 = vperm.slane %v2327_v35, 1  ;;  %v4457_v31 = vld [vmem:[%s4883_s12 + $0x3d8] sm:$0xff] }
 0x556   : > { %2698 = vmatpush.bf16.msrb.mxu0 %v4392_v39  ;;  %2711 = vmatpush.bf16.msrb.mxu1 %v4400_v40  ;;  %v2329_v40 = vperm.slane %v2327_v35, 0 }
 0x557   : > { %2722 = vmatpush.bf16.msrb.mxu2 %v4410_v47  ;;  %2735 = vmatpush.bf16.msrb.mxu3 %v4418_v48 }
 0x558   : > { %3969 = vmatmul.msk.bf16.vlgmr.msra.gmra.mxu2 %vm817_vm1, %v5057_v9  ;;  %3970 = vmatmul.msk.bf16.vlgmr.msra.gmra.mxu3 %vm817_vm1, %v5057_v9 }
 0x55a   : > { %2699 = vmatpush.bf16.msrb.mxu0 %v4391_v43  ;;  %2712 = vmatpush.bf16.msrb.mxu1 %v4399_v44 }
 0x55b   : > { %2723 = vmatpush.bf16.msrb.mxu2 %v4409_v52  ;;  %2736 = vmatpush.bf16.msrb.mxu3 %v4417_v53 }
 0x55e   : > { %2700 = vmatpush.bf16.msrb.mxu0 %v4390_v50  ;;  %2713 = vmatpush.bf16.msrb.mxu1 %v4398_v51  ;;  %v4437_v50 = vld [vmem:[%s4883_s12 + $0x338] sm:$0xff] }
 0x55f   : > { %2724 = vmatpush.bf16.msrb.mxu2 %v4408_v54  ;;  %2737 = vmatpush.bf16.msrb.mxu3 %v4416_v55  ;;  %v4445_v51 = vld [vmem:[%s4883_s12 + $0x378] sm:$0xff] }
 0x562   : > { %2810 = vmatpush.bf16.msra.mxu0 %v4118_v10  ;;  %2823 = vmatpush.bf16.msra.mxu1 %v4122_v16  ;;  %v4443_v16 = vld [vmem:[%s4883_s12 + $0x368] sm:$0xff] }
 0x563   : > { %2725 = vmatpush.bf16.msrb.mxu2 %v4407_v58  ;;  %2738 = vmatpush.bf16.msrb.mxu3 %v4415_v59  ;;  %v4436_v58 = vld [vmem:[%s4883_s12 + $0x330] sm:$0xff] }
 0x564   : > { %v4444_v59 = vld [vmem:[%s4883_s12 + $0x370] sm:$0xff] }
 0x566   : > { %2811 = vmatpush.bf16.msra.mxu0 %v4102_v21  ;;  %2824 = vmatpush.bf16.msra.mxu1 %v4106_v22  ;;  %v4453_v21 = vld [vmem:[%s4883_s12 + $0x3b8] sm:$0xff]  ;;  %v4452_v22 = vld [vmem:[%s4883_s12 + $0x3b0] sm:$0xff] }
 0x567   : > { %2726 = vmatpush.bf16.msrb.mxu2 %v4406_v5  ;;  %2739 = vmatpush.bf16.msrb.mxu3 %v4414_v6 }
 0x56b   : > { %2836 = vmatpush.bf16.msra.mxu2 %v4126_v28  ;;  %2849 = vmatpush.bf16.msra.mxu3 %v4130_v32  ;;  %v4450_v28 = vld [vmem:[%s4883_s12 + $0x3a0] sm:$0xff]  ;;  %v4448_v32 = vld [vmem:[%s4883_s12 + $0x390] sm:$0xff] }
 0x56f   : > { %2837 = vmatpush.bf16.msra.mxu2 %v4110_v36  ;;  %2850 = vmatpush.bf16.msra.mxu3 %v4114_v37  ;;  %v4447_v37 = vld [vmem:[%s4883_s12 + $0x388] sm:$0xff] }
 0x5ae   : > { %v2032_v45 = vpop.f32.mrf.mxu0  ;;  %v2045_v46 = vpop.f32.mrf.mxu1 }
 0x5af   : > { %v2046_v49 = vadd.f32 %v2045_v46, %v2032_v45 }
 0x5b6   : > { %v2034_v56 = vpop.f32.mrf.mxu0  ;;  %v2047_v57 = vpop.f32.mrf.mxu1 }
 0x5bb   : > { %v2058_v60 = vpop.f32.mrf.mxu2  ;;  %v2071_v61 = vpop.f32.mrf.mxu3 }
 0x5bc   : > { %v2059_v62 = vadd.f32 %v2058_v60, %v2046_v49  ;;  %v2331_v60 = vperm.slane %v2327_v35, 2 }
 0x5be   : > { %v2072_v12 = vadd.f32 %v2071_v61, %v2059_v62  ;;  %v2276_v14 = vpop.f32.mrf.mxu0  ;;  %v2289_v15 = vpop.f32.mrf.mxu1  ;;  %v2332_v61 = vperm.slane %v2327_v35, 3 }
 0x5c0   : > { %v2277_v17 = vadd.f32 %v2276_v14, %v2072_v12 }
 0x5c2   : > { %v2290_v3 = vadd.f32 %v2289_v15, %v2277_v17  ;;  %v4435_v15 = vld [vmem:[%s4883_s12 + $0x328] sm:$0xff]  ;;  %v4434_v17 = vld [vmem:[%s4883_s12 + $0x320] sm:$0xff] }
 0x5c3   : > { %v2060_v23 = vpop.f32.mrf.mxu2  ;;  %v2073_v24 = vpop.f32.mrf.mxu3 }
 0x5c4   : > { %v4460_v23 = vld [vmem:[%s4883_s12 + $0x3f0] sm:$0xff]  ;;  %v4431_v24 = vld [vmem:[%s4883_s12 + $0x308] sm:$0xff] }
 0x5c6   : > { %v2278_v4 = vpop.f32.mrf.mxu0  ;;  %v2291_v27 = vpop.f32.mrf.mxu1 }
 0x5c7   : > { %v4430_v4 = vld [vmem:[%s4883_s12 + $0x300] sm:$0xff] }
 0x5c8   : > { %v4438_v27 = vld [vmem:[%s4883_s12 + $0x340] sm:$0xff] }
 0x5cb   : > { %v2302_v38 = vpop.f32.mrf.mxu2  ;;  %v2315_v39 = vpop.f32.mrf.mxu3 }
 0x5cc   : > { %v2303_v42 = vadd.f32 %v2302_v38, %v2290_v3  ;;  %v4440_v3 = vld [vmem:[%s4883_s12 + $0x350] sm:$0xff]  ;;  %v4455_v38 = vld [vmem:[%s4883_s12 + $0x3c8] sm:$0xff] }
 0x5ce   : > { %v5226_v43 = vadd.f32 %v2315_v39, %v2303_v42  ;;  %v2386_v44 = vpop.f32.mrf.mxu0  ;;  %v2399_v45 = vpop.f32.mrf.mxu1  ;;  %v4446_v39 = vld [vmem:[%s4883_s12 + $0x380] sm:$0xff] }
 0x5cf   : > { %v2387_v46 = vadd.f32 %v2386_v44, %v2329_v40  ;;  %v2400_v47 = vadd.f32 %v2399_v45, %v2330_v41  ;;  %v4454_v40 = vld [vmem:[%s4883_s12 + $0x3c0] sm:$0xff]  ;;  %v2754_v44 = vld [vmem:[%s4872_s23 + $0xc] sm:$0xf] }
 0x5d0   : > { %v2756_v45 = vperm.slane %v2754_v44, 0 }
 0x5d1   : > { %v2429_v48 = vmax.f32 %v2387_v46, 0.0  ;;  %v2430_v49 = vmax.f32 %v2400_v47, 0.0  ;;  %v2757_v46 = vperm.slane %v2754_v44, 1 }
 0x5d3   : > { %v2497_v52 = vpack.c.bf16 %v2429_v48, %v2429_v48  ;;  %v2498_v53 = vpack.c.bf16 %v2430_v49, %v2430_v49  ;;  %v2304_v54 = vpop.f32.mrf.mxu2  ;;  %v2317_v55 = vpop.f32.mrf.mxu3 }
 0x5d5   : > { %2701 = vmatmul.bf16.vlgmr.msrb.gmra.mxu0 %v2497_v52  ;;  %2714 = vmatmul.bf16.vlgmr.msrb.gmra.mxu1 %v2498_v53 }
 0x5d6   : > { %v2388_v56 = vpop.f32.mrf.mxu0  ;;  %v2401_v57 = vpop.f32.mrf.mxu1  ;;  %3120 = vmatpush.bf16.msrb.mxu0 %v4437_v50  ;;  %3133 = vmatpush.bf16.msrb.mxu1 %v4445_v51 }
 0x5da   : > { %3121 = vmatpush.bf16.msrb.mxu0 %v4436_v58  ;;  %3134 = vmatpush.bf16.msrb.mxu1 %v4444_v59 }
 0x5db   : > { %v2412_v62 = vpop.f32.mrf.mxu2  ;;  %v2425_v63 = vpop.f32.mrf.mxu3 }
 0x5dc   : > { %v2413_v0 = vadd.f32 %v2412_v62, %v2331_v60  ;;  %v2426_v1 = vadd.f32 %v2425_v63, %v2332_v61 }
 0x5de   : > { %v2431_v5 = vmax.f32 %v2413_v0, 0.0  ;;  %v2432_v6 = vmax.f32 %v2426_v1, 0.0  ;;  %3122 = vmatpush.bf16.msrb.mxu0 %v4435_v15  ;;  %3135 = vmatpush.bf16.msrb.mxu1 %v4443_v16  ;;  %v2758_v0 = vperm.slane %v2754_v44, 2  ;;  %v2759_v1 = vperm.slane %v2754_v44, 3 }
 0x5e0   : > { %v2499_v10 = vpack.c.bf16 %v2431_v5, %v2431_v5  ;;  %v2500_v11 = vpack.c.bf16 %v2432_v6, %v2432_v6 }
 0x5e2   : > { %2727 = vmatmul.bf16.vlgmr.msrb.gmra.mxu2 %v2499_v10  ;;  %2740 = vmatmul.bf16.vlgmr.msrb.gmra.mxu3 %v2500_v11 }
 0x5e3   : > { %v2414_v12 = vpop.f32.mrf.mxu2  ;;  %v2427_v14 = vpop.f32.mrf.mxu3  ;;  %3123 = vmatpush.bf16.msrb.mxu0 %v4434_v17  ;;  %3136 = vmatpush.bf16.msrb.mxu1 %v4442_v18 }
 0x5e4   : > { %3146 = vmatpush.bf16.msrb.mxu2 %v4453_v21  ;;  %3159 = vmatpush.bf16.msrb.mxu3 %v4461_v7 }
 0x5e5   : > { %4131 = vmatmul.msk.bf16.vlgmr.msra.gmra.mxu0 %vm817_vm1, %v5057_v9  ;;  %4132 = vmatmul.msk.bf16.vlgmr.msra.gmra.mxu1 %vm817_vm1, %v5057_v9 }
 0x5e7   : > { %3124 = vmatpush.bf16.msrb.mxu0 %v4433_v19  ;;  %3137 = vmatpush.bf16.msrb.mxu1 %v4441_v20 }
 0x5e8   : > { %3147 = vmatpush.bf16.msrb.mxu2 %v4452_v22  ;;  %3160 = vmatpush.bf16.msrb.mxu3 %v4460_v23 }
 0x5eb   : > { %3138 = vmatpush.bf16.msrb.mxu1 %v4440_v3 }
 0x5ec   : > { %3148 = vmatpush.bf16.msrb.mxu2 %v4451_v26  ;;  %3161 = vmatpush.bf16.msrb.mxu3 %v4459_v13 }
 0x5ef   : > { %3139 = vmatpush.bf16.msrb.mxu1 %v4439_v25 }
 0x5f0   : > { %3149 = vmatpush.bf16.msrb.mxu2 %v4450_v28  ;;  %3162 = vmatpush.bf16.msrb.mxu3 %v4458_v29 }
 0x5f2   : > { %4133 = vmatmul.msk.bf16.vlgmr.msra.gmra.mxu2 %vm817_vm1, %v5057_v9  ;;  %4134 = vmatmul.msk.bf16.vlgmr.msra.gmra.mxu3 %vm817_vm1, %v5057_v9  ;;  %v4432_v9 = vld [vmem:[%s4883_s12 + $0x310] sm:$0xff] }
 0x5f3   : > { %3125 = vmatpush.bf16.msrb.mxu0 %v4432_v9  ;;  %3140 = vmatpush.bf16.msrb.mxu1 %v4438_v27 }
 0x5f4   : > { %3150 = vmatpush.bf16.msrb.mxu2 %v4449_v30  ;;  %3163 = vmatpush.bf16.msrb.mxu3 %v4457_v31 }
 0x5f7   : > { %3126 = vmatpush.bf16.msrb.mxu0 %v4431_v24  ;;  %v4554_v24 = vld [vmem:[%s692_s27] ss:$0 sm:$0xff] }
 0x5f8   : > { %3151 = vmatpush.bf16.msrb.mxu2 %v4448_v32  ;;  %3164 = vmatpush.bf16.msrb.mxu3 %v4456_v33 }
 0x5fb   : > { %3127 = vmatpush.bf16.msrb.mxu0 %v4430_v4 }
 0x5fc   : > { %3152 = vmatpush.bf16.msrb.mxu2 %v4447_v37  ;;  %3165 = vmatpush.bf16.msrb.mxu3 %v4455_v38 }
 0x600   : > { %3153 = vmatpush.bf16.msrb.mxu2 %v4446_v39  ;;  %3166 = vmatpush.bf16.msrb.mxu3 %v4454_v40 }
 0x652   : > { %v2702_v34 = vpop.f32.mrf.mxu0  ;;  %v2715_v35 = vpop.f32.mrf.mxu1 }
 0x653   : > { %v2716_v36 = vadd.f32 %v2715_v35, %v2702_v34 }
 0x65a   : > { %v2704_v41 = vpop.f32.mrf.mxu0  ;;  %v2717_v42 = vpop.f32.mrf.mxu1 }
 0x65b   : > { %v4555_v42 = vld [vmem:[%s695_s3] ss:$0 sm:$0xff] }
 0x662   : > { %v2813_v47 = vpop.f32.mrf.mxu0  ;;  %v2826_v48 = vpop.f32.mrf.mxu1 }
 0x663   : > { %v2814_v49 = vadd.f32 %v2813_v47, %v2756_v45  ;;  %v2827_v50 = vadd.f32 %v2826_v48, %v2757_v46 }
 0x665   : > { %v2856_v51 = vmax.f32 %v2814_v49, 0.0  ;;  %v2857_v52 = vmax.f32 %v2827_v50, 0.0  ;;  %v2728_v53 = vpop.f32.mrf.mxu2  ;;  %v2741_v54 = vpop.f32.mrf.mxu3 }
 0x666   : > { %v2729_v55 = vadd.f32 %v2728_v53, %v2716_v36 }
 0x667   : > { %v2924_v56 = vpack.c.bf16 %v2856_v51, %v2856_v51  ;;  %v2925_v57 = vpack.c.bf16 %v2857_v52, %v2857_v52 }
 0x668   : > { %v2742_v58 = vadd.f32 %v2741_v54, %v2729_v55 }
 0x669   : > { %3128 = vmatmul.bf16.vlgmr.msrb.gmra.mxu0 %v2924_v56  ;;  %3141 = vmatmul.bf16.vlgmr.msrb.gmra.mxu1 %v2925_v57 }
 0x66a   : > { %v2745_v59 = vadd.f32 %v2742_v58, %v5226_v43  ;;  %v2815_v60 = vpop.f32.mrf.mxu0  ;;  %v2828_v61 = vpop.f32.mrf.mxu1 }
 0x66d   : > { %v2730_v62 = vpop.f32.mrf.mxu2  ;;  %v2743_v63 = vpop.f32.mrf.mxu3 }
 0x675   : > { %v2839_v5 = vpop.f32.mrf.mxu2  ;;  %v2852_v6 = vpop.f32.mrf.mxu3 }
 0x676   : > { %v2840_v10 = vadd.f32 %v2839_v5, %v2758_v0  ;;  %v2853_v11 = vadd.f32 %v2852_v6, %v2759_v1 }
 0x678   : > { %v2858_v12 = vmax.f32 %v2840_v10, 0.0  ;;  %v2859_v14 = vmax.f32 %v2853_v11, 0.0 }
 0x67a   : > { %v2926_v15 = vpack.c.bf16 %v2858_v12, %v2858_v12  ;;  %v2927_v16 = vpack.c.bf16 %v2859_v14, %v2859_v14 }
 0x67c   : > { %3154 = vmatmul.bf16.vlgmr.msrb.gmra.mxu2 %v2926_v15  ;;  %3167 = vmatmul.bf16.vlgmr.msrb.gmra.mxu3 %v2927_v16 }
 0x67d   : > { %v2841_v17 = vpop.f32.mrf.mxu2  ;;  %v2854_v18 = vpop.f32.mrf.mxu3 }
 0x6e6   : > { %v3129_v43 = vpop.f32.mrf.mxu0  ;;  %v3142_v19 = vpop.f32.mrf.mxu1 }
 0x6e7   : > { %v3143_v7 = vadd.f32 %v3142_v19, %v3129_v43 }
 0x6ee   : > { %v3131_v20 = vpop.f32.mrf.mxu0  ;;  %v3144_v21 = vpop.f32.mrf.mxu1 }
 0x6ff   : > { %v3155_v9 = vpop.f32.mrf.mxu2  ;;  %v3168_v3 = vpop.f32.mrf.mxu3 }
 0x700   : > { %v3156_v22 = vadd.f32 %v3155_v9, %v3143_v7 }
 0x702   : > { %v3169_v23 = vadd.f32 %v3168_v3, %v3156_v22 }
 0x704   : > { %v3172_v25 = vadd.f32 %v3169_v23, %v2745_v59 }
 0x706   : > { %v3177_v26 = vadd.f32 %v4554_v24, %v3172_v25 }
 0x707   : > { %v3157_v13 = vpop.f32.mrf.mxu2  ;;  %v3170_v4 = vpop.f32.mrf.mxu3 }
 0x708   : > { %v3178_v27 = vadd.f32 %v3177_v26, %v5053_v8 }
 0x70a   : > { %v3181_v28 = vsel %vm817_vm1, %v3178_v27, 0.0 }
 0x70b   : > { %3182 = vadd.xlane.f32.xlu1 %v3181_v28 }
 0x77e   : > { %v3183_v29 = vpop.xlane.xlu1 %3182 }
 0x77f   : > { %v3184_v30 = vmul.f32 %v3183_v29, %v5001_v2 }
 0x781   : > { %v3185_v31 = vsub.f32 %v3178_v27, %v3184_v30 }
 0x783   : > { %v3186_v32 = vmul.f32 %v3185_v31, %v3185_v31 }
 0x785   : > { %v3187_v33 = vsel %vm817_vm1, %v3186_v32, 0.0 }
 0x786   : > { %3188 = vadd.xlane.f32.xlu2 %v3187_v33 }
 0x7f9   : > { %v3189_v34 = vpop.xlane.xlu2 %3188 }
 0x7fa   : > { %v3190_v35 = vmul.f32 %v3189_v34, %v5001_v2  ;;  %v4556_v2 = vld [vmem:[%s698_s14] ss:$0 sm:$0xff] }
 0x7fc   : > { %v3191_v36 = vadd.f32 1e-05, %v3190_v35 }
 0x7fe   : > { %4577 = vrsqrt.f32 %v3191_v36  ;;  %vm3198_vm9 = vweird.f32 %v3191_v36 }
 0x804   : > { %v4578_v37 = vpop.eup %4577 }
 0x805   : > { %v3193_v8 = vmul.f32 %v4578_v37, %v3191_v36  ;;  %vm3199_vm8 = vweird.f32 %v4578_v37 }
 0x806   : > { %vm3200_vm10 = vmor %vm3198_vm9, %vm3199_vm8 }
 0x807   : > { %v3194_v38 = vmul.f32 %v4578_v37, %v3193_v8 }
 0x809   : > { %v3195_v39 = vmul.f32 0.5, %v3194_v38 }
 0x80b   : > { %v3196_v40 = vsub.f32 1.5, %v3195_v39 }
 0x80d   : > { %v3197_v41 = vmul.f32 %v4578_v37, %v3196_v40 }
 0x80f   : > { %v3201_v44 = vsel %vm3200_vm10, %v4578_v37, %v3197_v41 }
 0x810   : > { %v3202_v45 = vmul.f32 %v3201_v44, %v3185_v31 }
 0x812   : > { %v3206_v46 = vmul.f32 %v4555_v42, %v3202_v45  ;;  %3215 = sbr.rel (%p4263_p1) target bundleno = 2229 (0x8b5), region = 88 }
 0x814   : > { %v3210_v47 = vadd.f32 %v4556_v2, %v3206_v46 }
 0x816   : > { %3211 = vst.msk [vmem:[#allocation2] sm:$0xff] %vm817_vm1, %v3210_v47 }
 0x817   : > { %v4463_v48 = vld [vmem:[%s5418_s2 + $0x8] sm:$0xff]  ;;  %v4678_v51 = vmov 8.0   ;;  %v4462_v52 = vld [vmem:[%s5418_s2] sm:$0xff] }
 0x818   : > { %4579 = vrcp.f32 %v4678_v51  ;;  %3259 = vmatpush.bf16.msra.mxu0 %v4463_v48  ;;  %v3237_v6 = vld [vmem:[%s5419_s13] sm:$0x1] }
 0x81c   : > { %3260 = vmatpush.bf16.msra.mxu0 %v4462_v52 }
 0x81d   : > { %v3216_v49 = vld [vmem:[#allocation2] sm:$0xff] }
 0x81e   : > { %v3217_v50 = vsel %vm817_vm1, %v3216_v49, 0.0  ;;  %v4580_v56 = vpop.eup %4579 }
 0x81f   : > { %v3218_v53 = vrot.slane %v3217_v50, 4  ;;  %v3225_v58 = vmul.f32 8.0, %v4580_v56  ;;  %vm3229_vm11 = vweird.f32 %v4580_v56 }
 0x821   : > { %v3219_v54 = vadd.f32 %v3218_v53, %v3217_v50  ;;  %v3226_v60 = vsub.f32 1.0, %v3225_v58 }
 0x823   : > { %v3220_v55 = vrot.slane %v3219_v54, 2  ;;  %v3227_v61 = vmul.f32 %v4580_v56, %v3226_v60 }
 0x825   : > { %v3221_v57 = vadd.f32 %v3220_v55, %v3219_v54  ;;  %v3228_v63 = vadd.f32 %v4580_v56, %v3227_v61 }
 0x827   : > { %v3222_v59 = vrot.slane %v3221_v57, 1  ;;  %v3230_v0 = vsel %vm3229_vm11, %v4580_v56, %v3228_v63 }
 0x829   : > { %v3223_v62 = vadd.f32 %v3222_v59, %v3221_v57 }
 0x82b   : > { %v3231_v1 = vmul.f32 %v3230_v0, %v3223_v62 }
 0x82d   : > { %v3232_v5 = vpack.c.bf16 %v3231_v1, %v3231_v1 }
 0x82f   : > { %4272 = vmatmul.msk.bf16.vlgmr.msra.gmra.mxu0 %vm817_vm1, %v3232_v5 }
 0x8ac   : > { %v3262_v10 = vpop.f32.mrf.mxu0 }
 0x8ad   : > { %v3263_v11 = vadd.f32 %v3262_v10, %v3237_v6 }
 0x8af   : > { %3266 = vst [vmem:[%s4899_s28] sm:$0x1] %v3263_v11 }
 0x8b4   : > { %v3264_v12 = vpop.f32.mrf.mxu0 }
 0x8b5 PF: > { %s5420_s24 = sld [smem:[#allocation9_spill]]  ;;  %s3278_s29 = sshll.u32 %s4899_s28, 4  ;;  %s3279_s29 = int_to_ptr.vmem [resolvable:$true] %s3278_s29 }
 0x8b6   : > { %s5421_s25 = sld [smem:[#allocation27_spill]]  ;;  %s5424_s21 = sand.u32 1, %s4651_s19  }
 0x8b7   : > { %s3268_s16 = scalar_lea.sflag [#allocation4], %s5424_s21 }
 0x8bc   : > { %s5422_s0 = smov %s5421_s25  ;;  %s3276_s23 = scalar_lea.hbm %s5421_s25, %s5420_s24 }
 0x8bd   : > { %s3280_s12 = sshll.u32 %s3276_s23, 4  ;;  %s4601_s1 = scalar_lea.hbm %s5422_s0, 2  ;;  %s3281_s12 = int_to_ptr.hbm [resolvable:$true] %s3280_s12 }
 0x8be   : > { %s4595_s27 = sshra.s32 %s3281_s12, 4  ;;  %s4596_s27 = int_to_ptr.hbm [resolvable:$true] %s4595_s27 }
 0x8bf   : > { %s4597_s20 = scalar_lea.hbm %s4596_s27, 1  ;;  %p4602_p6 = scmp.lt.s32.totalorder %s4596_s27, %s5422_s0 }
 0x8c0   : > { %p4598_p2 = scmp.ne.s32.totalorder %s4596_s27, %s4597_s20  ;;  %p4603_p7 = scmp.lt.s32.totalorder %s4601_s1, %s4597_s20 }
 0x8c2   : > { %p4599_p4 = pnand %p4598_p2, %p4808_p3  ;;  %p4604_p8 = por %p4603_p7, %p4602_p6 }
 0x8c4   : > { %p4600_p5 = pneg %p4599_p4 }
 0x8c6   : > { %p4605_p10 = pnand %p4604_p8, %p4600_p5 }
 0x8c8   : > { %4608 = shalt.err (!%p4605_p10)
}
 0x8c9   : > { %4466 = dma.vmem_to_hbm [thread:$0]  (%p4808_p3), %s3279_s29, 16, %s3281_s12, %s3268_s16  }
 0x8ca PF: > { %s5425_s28 = sld [smem:[#allocation12_spill]] }
 0x8cb   : > { %s5426_s14 = sld [smem:[#allocation6_spill]] }
 0x8d0   : > { %p4472_p11 = scmp.ge.s32.totalorder %s5425_s28, 2 }
 0x8d1   : > { %s3292_s13 = sand.u32 1, %s5426_s14  }
 0x8d2   : > { %p4469_p12 = pnand %p4472_p11, %p4818_p9  ;;  %s3293_s24 = scalar_lea.sflag [#allocation4], %s3292_s13 }
 0x8d4   : > { %p4470_p13 = pneg %p4469_p12 }
 0x8d6   : > { %4642 = dma.done.wait (%p4470_p13), %s3293_s24, 16  }
 0x8d7   : > { %4644 = vsyncadd (%p4470_p13), %s3293_s24, 4294967280  ;;  %s28_s25 = sadd.s32 1, %s5425_s28   ;;  %s5428_s30 = sld [smem:[#allocation7_spill]] }
 0x8d8   : > { %p25_p0 = scmp.ge.s32.totalorder %s28_s25, 6   ;;  %s5429_s20 = sld [smem:[#allocation17_spill]] }
 0x8d9   : > { %s5430_s21 = sld [smem:[#allocation10_spill]]  ;;  %s5434_s18 = smov %s4651_s19 }
 0x8da   : > { %s5431_s22 = sld [smem:[#allocation11_spill]]  ;;  %27 = sbr.rel (!%p25_p0) target bundleno = 15 (0xf), region = 159 }
 0x8db   : > { %s5432_s23 = sld [smem:[#allocation13_spill]] }
 0x8dc   : > { %s5433_s24 = sld [smem:[#allocation15_spill]] }
 0x8dd   : > { %s5435_s19 = smov %s5428_s30 }
 0x8df   :  { %3298 = vsyncpa [#allocation4], 1 }
 0x8e0   :  { %3300 = vsyncpa [#allocation4 + $0x1], 1 }

</bundles_post_ra>
